<compile_context>
chip_gen: v7x
topology: tpu7x:2x2x1
jax: 0.10.0
libtpu: 0.0.40
codegen_flags: <defaults>
</compile_context>

<pallas_src>
import functools

import jax
import jax.numpy as jnp
from jax import lax
from jax.experimental import pallas as pl
from jax.experimental.pallas import tpu as pltpu


# ----------------------------- Pallas kernel --------------------------------

def _lstm_fc_kernel(x_ref,                       # (Tc*B, F) chunk, time-major
                    wih0_ref, b0_ref,            # layer-0 input proj: (F,4H), (1,4H)
                    wf_ref, b1_ref,              # fused recurrent: (2H,8H), (1,4H)
                    fw1_ref, fb1_ref,            # fc: Linear(H,32)  (H,32), (1,32)
                    fw2_ref, fb2_ref,            # fc: Linear(32,out_pad)
                    out_ref,                     # (B, out_pad)
                    xproj_ref,                   # VMEM (Tc*B, 4H) scratch
                    chh_ref,                     # VMEM (3, B, H) persistent c1,h2,c2
                    rec0_ref,                    # VMEM (B, 4H) persistent h1 @ Whh0^T
                    *, seq_len, mask_tail):
    c_idx = pl.program_id(0)
    n_chunks = pl.num_programs(0)

    B = out_ref.shape[0]
    H = chh_ref.shape[2]
    G = 4 * H
    Tc = xproj_ref.shape[0] // B

    # ---- first chunk: zero the persistent state ------------------------------
    @pl.when(c_idx == 0)
    def _init():
        chh_ref[...] = jnp.zeros_like(chh_ref)
        rec0_ref[...] = jnp.zeros_like(rec0_ref)

    # ---- loop-invariant per chunk --------------------------------------------
    # Layer-0 input projection for all Tc timesteps in ONE MXU call (bias folded in);
    # only the recurrent terms stay on the serial per-step path.
    xproj_ref[...] = (
        jnp.dot(x_ref[...], wih0_ref[...], preferred_element_type=jnp.float32)
        + b0_ref[...])

    wf = wf_ref[...]                                    # (2H, 8H) fused recurrent weight
    b1 = jnp.broadcast_to(b1_ref[...], (B, G))          # hoisted broadcast

    # lane mask selecting the g-gate (lanes [2H, 3H)) of a (B, 4H) gate tensor
    lane = lax.broadcasted_iota(jnp.int32, (B, G), 1)
    g_lane = (lane >= 2 * H) & (lane < 3 * H)

    def activate(gates):
        # Single EUP pass: tanh(x) = 2*sigmoid(2x) - 1 on the g lanes, sigmoid elsewhere.
        pre = jnp.where(g_lane, gates + gates, gates)
        s = jax.nn.sigmoid(pre)
        return jnp.where(g_lane, s + s - 1.0, s)

    def combine(act, c_prev):
        i_g = act[:, 0:H]
        f_g = act[:, H:2 * H]
        g_g = act[:, 2 * H:3 * H]
        o_g = act[:, 3 * H:4 * H]
        c_new = f_g * c_prev + i_g * g_g
        return o_g * jnp.tanh(c_new), c_new

    base = c_idx * Tc                                   # global time offset of chunk

    # ---- time recurrence: state lives in vregs, one fused matmul per step -----
    def step(t, carry):
        c1, h2, c2, rec0 = carry

        off = pl.multiple_of(t * B, 8)                  # aligned sublane offset
        xp = xproj_ref[pl.ds(off, B), :]                # (B, 4H)

        # layer 0, step t: gates = x_t Wih0^T + b0 + h1_{t-1} Whh0^T (= rec0)
        h1n, c1n = combine(activate(xp + rec0), c1)

        # fused matmul: [h1_t | h2_{t-1}] @ [[Whh0^T | Wih1^T],[0 | Whh1^T]]
        #   cols [0,4H):  h1_t Whh0^T            -> layer-0 recurrent gates for t+1
        #   cols [4H,8H): layer-1 gates (pre-bias) for step t
        fused = jnp.dot(jnp.concatenate([h1n, h2], axis=1), wf,
                        preferred_element_type=jnp.float32)
        rec0n = fused[:, 0:G]
        h2n, c2n = combine(activate(fused[:, G:2 * G] + b1), c2)

        if mask_tail:
            # padded tail steps (global index >= seq_len) must not update the state
            keep = ((base + t) < seq_len).astype(jnp.float32)
            c1n = c1 + keep * (c1n - c1)
            h2n = h2 + keep * (h2n - h2)
            c2n = c2 + keep * (c2n - c2)
            rec0n = rec0 + keep * (rec0n - rec0)
        return (c1n, h2n, c2n, rec0n)

    carry0 = (chh_ref[0], chh_ref[1], chh_ref[2], rec0_ref[...])
    unroll = True if Tc <= 8 else 8
    c1, h2, c2, rec0 = lax.fori_loop(0, Tc, step, carry0, unroll=unroll)

    # persist state for the next chunk (once per chunk, off the per-step path)
    chh_ref[0] = c1
    chh_ref[1] = h2
    chh_ref[2] = c2
    rec0_ref[...] = rec0

    # ---- FC head on the last hidden state of layer 1 (last chunk only) --------
    @pl.when(c_idx == n_chunks - 1)
    def _finalize():
        z = jnp.maximum(
            jnp.dot(h2, fw1_ref[...], preferred_element_type=jnp.float32)
            + fb1_ref[...], 0.0)
        y = (jnp.dot(z, fw2_ref[...], preferred_element_type=jnp.float32)
             + fb2_ref[...])
        out_ref[...] = y.astype(out_ref.dtype)


# --------------------------------- wrapper -----------------------------------

def _padded_vmem_bytes(shape, itemsize=4):
    """Rough VMEM footprint of an f32 buffer ((8,128)-padded last two dims)."""
    s = (1,) * (2 - len(shape)) + tuple(shape)
    lead = 1
    for d in s[:-2]:
        lead *= d
    rows = ((s[-2] + 7) // 8) * 8
    cols = ((s[-1] + 127) // 128) * 128
    return lead * rows * cols * itemsize


def multivar_lstm_forward(x, params, *, hidden_size, output_size, predict_steps,
                          time_chunk=128):
    """x: (B, T, F) float32, batch-first like the PyTorch module."""
    B, T, F = x.shape
    H = hidden_size
    G = 4 * H
    out_dim = output_size * predict_steps

    B_pad = ((B + 7) // 8) * 8                    # fill sublanes / MXU rows
    out_pad = ((out_dim + 127) // 128) * 128      # lane-dense output store

    Tc = max(1, min(T, time_chunk))               # timesteps per grid step
    n_chunks = -(-T // Tc)
    T_pad = n_chunks * Tc
    mask_tail = T_pad != T

    # time-major, batch/time padded, flattened to (T_pad*B_pad, F)
    x_tm = jnp.transpose(x, (1, 0, 2)).astype(jnp.float32)
    x_tm = jnp.pad(x_tm, ((0, T_pad - T), (0, B_pad - B), (0, 0)))
    x_flat = x_tm.reshape(T_pad * B_pad, F)

    # fused recurrent weight: [h1_t | h2_{t-1}] @ [[Whh0^T | Wih1^T], [0 | Whh1^T]]
    w_fused = jnp.concatenate([
        jnp.concatenate([params["w_hh0_T"], params["w_ih1_T"]], axis=1),
        jnp.concatenate([jnp.zeros((H, G), jnp.float32), params["w_hh1_T"]], axis=1),
    ], axis=0)                                    # (2H, 8H)

    # pad FC output to a multiple of 128 lanes (zero columns; sliced back below)
    fw2 = jnp.zeros((32, out_pad), jnp.float32).at[:, :out_dim].set(params["fc_w2_T"])
    fb2 = jnp.zeros((1, out_pad), jnp.float32).at[:, :out_dim].set(params["fc_b2"])

    inputs = (x_flat,
              params["w_ih0_T"], params["b0"],
              w_fused, params["b1"],
              params["fc_w1_T"], params["fc_b1"], fw2, fb2)

    in_specs = [
        pl.BlockSpec((Tc * B_pad, F), lambda c: (c, 0)),   # x: streamed per chunk
        pl.BlockSpec((F, G), lambda c: (0, 0)),            # weights: resident
        pl.BlockSpec((1, G), lambda c: (0, 0)),
        pl.BlockSpec((2 * H, 2 * G), lambda c: (0, 0)),
        pl.BlockSpec((1, G), lambda c: (0, 0)),
        pl.BlockSpec((H, 32), lambda c: (0, 0)),
        pl.BlockSpec((1, 32), lambda c: (0, 0)),
        pl.BlockSpec((32, out_pad), lambda c: (0, 0)),
        pl.BlockSpec((1, out_pad), lambda c: (0, 0)),
    ]
    out_spec = pl.BlockSpec((B_pad, out_pad), lambda c: (0, 0))

    scratch_shapes = [
        pltpu.VMEM((Tc * B_pad, G), jnp.float32),   # per-chunk input projection
        pltpu.VMEM((3, B_pad, H), jnp.float32),     # persistent c1, h2, c2
        pltpu.VMEM((B_pad, G), jnp.float32),        # persistent h1 @ Whh0^T
    ]

    # scoped-VMEM budget from the real footprint (streamed buffers double-buffered)
    est = (2 * _padded_vmem_bytes((Tc * B_pad, F))
           + 2 * _padded_vmem_bytes((B_pad, out_pad))
           + sum(_padded_vmem_bytes(a.shape) for a in inputs[1:])
           + _padded_vmem_bytes((Tc * B_pad, G))
           + 3 * _padded_vmem_bytes((B_pad, H))
           + _padded_vmem_bytes((B_pad, G)))
    vmem_limit = int(min(max(2 * est + (4 << 20), 16 << 20), 64 << 20))

    kernel = functools.partial(_lstm_fc_kernel, seq_len=T, mask_tail=mask_tail)

    out = pl.pallas_call(
        kernel,
        out_shape=jax.ShapeDtypeStruct((B_pad, out_pad), jnp.float32),
        grid=(n_chunks,),
        in_specs=in_specs,
        out_specs=out_spec,
        scratch_shapes=scratch_shapes,
        compiler_params=pltpu.CompilerParams(
            dimension_semantics=("arbitrary",),
            vmem_limit_bytes=vmem_limit),
    )(*inputs)

    # matches `out.view(-1, predict_steps, 3)` in the PyTorch module
    return out[:B, :out_dim].reshape(-1, predict_steps, output_size)


# ------------------------- deterministic parameters --------------------------

def init_params(key, *, input_size, hidden_size, output_size, predict_steps):
    H = hidden_size
    k_lstm = 1.0 / jnp.sqrt(jnp.float32(H))
    out_dim = output_size * predict_steps

    keys = jax.random.split(key, 12)
    u = lambda k, shape, bound: jax.random.uniform(
        k, shape, jnp.float32, minval=-bound, maxval=bound)

    # nn.LSTM parameters (gate order i, f, g, o), stored pre-transposed for x @ W^T
    w_ih0 = u(keys[0], (4 * H, input_size), k_lstm)
    w_hh0 = u(keys[1], (4 * H, H), k_lstm)
    b_ih0 = u(keys[2], (4 * H,), k_lstm)
    b_hh0 = u(keys[3], (4 * H,), k_lstm)
    w_ih1 = u(keys[4], (4 * H, H), k_lstm)
    w_hh1 = u(keys[5], (4 * H, H), k_lstm)
    b_ih1 = u(keys[6], (4 * H,), k_lstm)
    b_hh1 = u(keys[7], (4 * H,), k_lstm)

    # fc = Linear(H, 32) -> ReLU -> Linear(32, out_dim)
    k1 = 1.0 / jnp.sqrt(jnp.float32(H))
    k2 = 1.0 / jnp.sqrt(jnp.float32(32))
    fc_w1 = u(keys[8], (32, H), k1)
    fc_b1 = u(keys[9], (32,), k1)
    fc_w2 = u(keys[10], (out_dim, 32), k2)
    fc_b2 = u(keys[11], (out_dim,), k2)

    return {
        "w_ih0_T": w_ih0.T, "w_hh0_T": w_hh0.T, "b0": (b_ih0 + b_hh0)[None, :],
        "w_ih1_T": w_ih1.T, "w_hh1_T": w_hh1.T, "b1": (b_ih1 + b_hh1)[None, :],
        "fc_w1_T": fc_w1.T, "fc_b1": fc_b1[None, :],
        "fc_w2_T": fc_w2.T, "fc_b2": fc_b2[None, :],
    }


# ------------------------------ pure-JAX reference ---------------------------

def reference_forward(x, params, *, hidden_size, output_size, predict_steps):
    B, T, F = x.shape
    H = hidden_size

    def cell(x_t, h, c, wih_T, whh_T, b):
        gates = x_t @ wih_T + h @ whh_T + b
        i = jax.nn.sigmoid(gates[:, 0 * H:1 * H])
        f = jax.nn.sigmoid(gates[:, 1 * H:2 * H])
        g = jnp.tanh(gates[:, 2 * H:3 * H])
        o = jax.nn.sigmoid(gates[:, 3 * H:4 * H])
        c_new = f * c + i * g
        return o * jnp.tanh(c_new), c_new

    h1 = c1 = h2 = c2 = jnp.zeros((B, H), jnp.float32)
    for t in range(T):
        h1, c1 = cell(x[:, t, :], h1, c1, params["w_ih0_T"], params["w_hh0_T"], params["b0"])
        h2, c2 = cell(h1, h2, c2, params["w_ih1_T"], params["w_hh1_T"], params["b1"])
    z = jnp.maximum(h2 @ params["fc_w1_T"] + params["fc_b1"], 0.0)
    y = z @ params["fc_w2_T"] + params["fc_b2"]
    return y.reshape(-1, predict_steps, output_size)


# ------------------------------------ main -----------------------------------

if __name__ == "__main__":
    # small shapes consistent with the module's forward
    B, T = 2, 8
    input_size, hidden_size, output_size = 3, 32, 3
    predict_steps = 4

    key = jax.random.PRNGKey(0)
    kx, kp = jax.random.split(key)
    x = jax.random.normal(kx, (B, T, input_size), dtype=jnp.float32)
    params = init_params(kp, input_size=input_size, hidden_size=hidden_size,
                         output_size=output_size, predict_steps=predict_steps)

    ref = reference_forward(x, params, hidden_size=hidden_size,
                            output_size=output_size, predict_steps=predict_steps)

    fwd = functools.partial(multivar_lstm_forward, hidden_size=hidden_size,
                            output_size=output_size, predict_steps=predict_steps)

    # single-chunk path (whole sequence handled in one grid step)
    out1 = jax.block_until_ready(fwd(x, params))
    assert out1.shape == (B, predict_steps, output_size), out1.shape
    err1 = float(jnp.max(jnp.abs(out1 - ref)))
    assert jnp.allclose(out1, ref, atol=1e-4, rtol=1e-4), f"max abs err {err1}"

    # multi-chunk path (exercises state persistence across grid steps + tail masking)
    out2 = jax.block_until_ready(fwd(x, params, time_chunk=3))
    err2 = float(jnp.max(jnp.abs(out2 - ref)))
    assert jnp.allclose(out2, ref, atol=1e-4, rtol=1e-4), f"max abs err {err2}"

    print("KERNEL_OK")
</pallas_src>

<mosaic_0001>
module attributes {stable_mosaic.version = 11 : i64} {
  func.func @_lstm_fc_kernel(%arg0: i32, %arg1: memref<64x3xf32, #tpu.memory_space<vmem>>, %arg2: memref<3x128xf32, #tpu.memory_space<vmem>>, %arg3: memref<1x128xf32, #tpu.memory_space<vmem>>, %arg4: memref<64x256xf32, #tpu.memory_space<vmem>>, %arg5: memref<1x128xf32, #tpu.memory_space<vmem>>, %arg6: memref<32x32xf32, #tpu.memory_space<vmem>>, %arg7: memref<1x32xf32, #tpu.memory_space<vmem>>, %arg8: memref<32x128xf32, #tpu.memory_space<vmem>>, %arg9: memref<1x128xf32, #tpu.memory_space<vmem>>, %arg10: memref<8x128xf32, #tpu.memory_space<vmem>>, %arg11: memref<64x128xf32, #tpu.memory_space<vmem>>, %arg12: memref<3x8x32xf32, #tpu.memory_space<vmem>>, %arg13: memref<8x128xf32, #tpu.memory_space<vmem>>) attributes {dimension_semantics = [#tpu.dimension_semantics<arbitrary>], iteration_bounds = array<i64: 1>, scalar_prefetch = 0 : i64, scratch_operands = 3 : i64, tpu.core_type = #tpu.core_type<tc>, window_params = [{transform_indices = @transform_0, window_bounds = array<i64: 64, 3>}, {pipeline_mode = #tpu.pipeline_mode<synchronous>, transform_indices = @transform_1, window_bounds = array<i64: 3, 128>}, {pipeline_mode = #tpu.pipeline_mode<synchronous>, transform_indices = @transform_2, window_bounds = array<i64: 1, 128>}, {pipeline_mode = #tpu.pipeline_mode<synchronous>, transform_indices = @transform_3, window_bounds = array<i64: 64, 256>}, {pipeline_mode = #tpu.pipeline_mode<synchronous>, transform_indices = @transform_4, window_bounds = array<i64: 1, 128>}, {pipeline_mode = #tpu.pipeline_mode<synchronous>, transform_indices = @transform_5, window_bounds = array<i64: 32, 32>}, {pipeline_mode = #tpu.pipeline_mode<synchronous>, transform_indices = @transform_6, window_bounds = array<i64: 1, 32>}, {pipeline_mode = #tpu.pipeline_mode<synchronous>, transform_indices = @transform_7, window_bounds = array<i64: 32, 128>}, {pipeline_mode = #tpu.pipeline_mode<synchronous>, transform_indices = @transform_8, window_bounds = array<i64: 1, 128>}, {pipeline_mode = #tpu.pipeline_mode<synchronous>, transform_indices = @transform_9, window_bounds = array<i64: 8, 128>}]} {
    %c0_i32 = arith.constant 0 : i32
    %0 = arith.cmpi eq, %arg0, %c0_i32 : i32
    %1 = arith.extui %0 : i1 to i32
    %c0_i32_0 = arith.constant 0 : i32
    %2 = arith.cmpi ne, %1, %c0_i32_0 : i32
    scf.if %2 {
      %cst_91 = arith.constant 0.000000e+00 : f32
      %440 = vector.broadcast %cst_91 : f32 to vector<3x8x32xf32>
      %c0_92 = arith.constant 0 : index
      %c0_93 = arith.constant 0 : index
      %c0_94 = arith.constant 0 : index
      %441 = vector.load %arg12[%c0_92, %c0_93, %c0_94] : memref<3x8x32xf32, #tpu.memory_space<vmem>>, vector<3x8x32xf32>
      tpu.vector_store %arg12[%c0_92, %c0_93, %c0_94], %440 {strides = array<i32>} : memref<3x8x32xf32, #tpu.memory_space<vmem>>, vector<3x8x32xf32>,
      %cst_95 = arith.constant 0.000000e+00 : f32
      %442 = vector.broadcast %cst_95 : f32 to vector<8x128xf32>
      %c0_96 = arith.constant 0 : index
      %c0_97 = arith.constant 0 : index
      %443 = vector.load %arg13[%c0_96, %c0_97] : memref<8x128xf32, #tpu.memory_space<vmem>>, vector<8x128xf32>
      tpu.vector_store %arg13[%c0_96, %c0_97], %442 {strides = array<i32>} : memref<8x128xf32, #tpu.memory_space<vmem>>, vector<8x128xf32>,
    } else {
    }
    %c0 = arith.constant 0 : index
    %c0_1 = arith.constant 0 : index
    %3 = vector.load %arg1[%c0, %c0_1] : memref<64x3xf32, #tpu.memory_space<vmem>>, vector<64x3xf32>
    %c0_2 = arith.constant 0 : index
    %c0_3 = arith.constant 0 : index
    %4 = vector.load %arg2[%c0_2, %c0_3] : memref<3x128xf32, #tpu.memory_space<vmem>>, vector<3x128xf32>
    %cst = arith.constant dense<0.000000e+00> : vector<64x128xf32>
    %5 = tpu.matmul %3, %4, %cst {dimension_numbers = #tpu.dot_dimension_numbers<[1], [0], [0], [1], [0, 0, 1, 1], [], []>} : vector<64x3xf32>, vector<3x128xf32>, vector<64x128xf32> -> vector<64x128xf32>
    %c0_4 = arith.constant 0 : index
    %c0_5 = arith.constant 0 : index
    %6 = vector.load %arg3[%c0_4, %c0_5] : memref<1x128xf32, #tpu.memory_space<vmem>>, vector<1x128xf32>
    %7 = vector.broadcast %6 : vector<1x128xf32> to vector<64x128xf32>
    %8 = arith.addf %5, %7 : vector<64x128xf32>
    %c0_6 = arith.constant 0 : index
    %c0_7 = arith.constant 0 : index
    %9 = vector.load %arg11[%c0_6, %c0_7] : memref<64x128xf32, #tpu.memory_space<vmem>>, vector<64x128xf32>
    tpu.vector_store %arg11[%c0_6, %c0_7], %8 {strides = array<i32>} : memref<64x128xf32, #tpu.memory_space<vmem>>, vector<64x128xf32>,
    %c0_8 = arith.constant 0 : index
    %c0_9 = arith.constant 0 : index
    %10 = vector.load %arg4[%c0_8, %c0_9] : memref<64x256xf32, #tpu.memory_space<vmem>>, vector<64x256xf32>
    %c0_10 = arith.constant 0 : index
    %c0_11 = arith.constant 0 : index
    %11 = vector.load %arg5[%c0_10, %c0_11] : memref<1x128xf32, #tpu.memory_space<vmem>>, vector<1x128xf32>
    %12 = vector.shape_cast %11 : vector<1x128xf32> to vector<1x128xf32>
    %13 = vector.broadcast %12 : vector<1x128xf32> to vector<8x128xf32>
    %14 = tpu.iota {dimensions = array<i32: 1>} : vector<8x128xi32>
    %c64_i32 = arith.constant 64 : i32
    %15 = vector.broadcast %c64_i32 : i32 to vector<8x128xi32>
    %16 = arith.cmpi sge, %14, %15 : vector<8x128xi32>
    %c96_i32 = arith.constant 96 : i32
    %17 = vector.broadcast %c96_i32 : i32 to vector<8x128xi32>
    %18 = arith.cmpi slt, %14, %17 : vector<8x128xi32>
    %19 = arith.andi %16, %18 : vector<8x128xi1>
    %c0_12 = arith.constant 0 : index
    %c0_13 = arith.constant 0 : index
    %c0_14 = arith.constant 0 : index
    %20 = vector.load %arg12[%c0_12, %c0_13, %c0_14] : memref<3x8x32xf32, #tpu.memory_space<vmem>>, vector<1x8x32xf32>
    %21 = vector.shape_cast %20 : vector<1x8x32xf32> to vector<8x32xf32>
    %c1 = arith.constant 1 : index
    %c0_15 = arith.constant 0 : index
    %c0_16 = arith.constant 0 : index
    %22 = vector.load %arg12[%c1, %c0_15, %c0_16] : memref<3x8x32xf32, #tpu.memory_space<vmem>>, vector<1x8x32xf32>
    %23 = vector.shape_cast %22 : vector<1x8x32xf32> to vector<8x32xf32>
    %c2 = arith.constant 2 : index
    %c0_17 = arith.constant 0 : index
    %c0_18 = arith.constant 0 : index
    %24 = vector.load %arg12[%c2, %c0_17, %c0_18] : memref<3x8x32xf32, #tpu.memory_space<vmem>>, vector<1x8x32xf32>
    %25 = vector.shape_cast %24 : vector<1x8x32xf32> to vector<8x32xf32>
    %c0_19 = arith.constant 0 : index
    %c0_20 = arith.constant 0 : index
    %26 = vector.load %arg13[%c0_19, %c0_20] : memref<8x128xf32, #tpu.memory_space<vmem>>, vector<8x128xf32>
    %c0_i32_21 = arith.constant 0 : i32
    %c8_i32 = arith.constant 8 : i32
    %27 = arith.muli %c0_i32_21, %c8_i32 : i32
    %28 = tpu.assume_multiple %27, 8 : i32
    %29 = arith.index_cast %28 : i32 to index
    %c0_22 = arith.constant 0 : index
    %30 = vector.load %arg11[%29, %c0_22] : memref<64x128xf32, #tpu.memory_space<vmem>>, vector<8x128xf32>
    %31 = arith.addf %30, %26 : vector<8x128xf32>
    %32 = arith.addf %31, %31 : vector<8x128xf32>
    %33 = arith.select %19, %32, %31 : vector<8x128xi1>, vector<8x128xf32>
    %34 = arith.negf %33 : vector<8x128xf32>
    %35 = math.exp %34 : vector<8x128xf32>
    %cst_23 = arith.constant 1.000000e+00 : f32
    %36 = vector.broadcast %cst_23 : f32 to vector<8x128xf32>
    %37 = arith.addf %36, %35 : vector<8x128xf32>
    %38 = arith.divf %36, %37 : vector<8x128xf32>
    %39 = arith.addf %38, %38 : vector<8x128xf32>
    %cst_24 = arith.constant 1.000000e+00 : f32
    %40 = vector.broadcast %cst_24 : f32 to vector<8x128xf32>
    %41 = arith.subf %39, %40 : vector<8x128xf32>
    %42 = arith.select %19, %41, %38 : vector<8x128xi1>, vector<8x128xf32>
    %43 = vector.extract_strided_slice %42 {offsets = [0, 0], sizes = [8, 32], strides = [1, 1]} : vector<8x128xf32> to vector<8x32xf32>
    %44 = vector.extract_strided_slice %42 {offsets = [0, 32], sizes = [8, 32], strides = [1, 1]} : vector<8x128xf32> to vector<8x32xf32>
    %45 = vector.extract_strided_slice %42 {offsets = [0, 64], sizes = [8, 32], strides = [1, 1]} : vector<8x128xf32> to vector<8x32xf32>
    %46 = vector.extract_strided_slice %42 {offsets = [0, 96], sizes = [8, 32], strides = [1, 1]} : vector<8x128xf32> to vector<8x32xf32>
    %47 = arith.mulf %44, %21 : vector<8x32xf32>
    %48 = arith.mulf %43, %45 : vector<8x32xf32>
    %49 = arith.addf %47, %48 : vector<8x32xf32>
    %50 = math.tanh %49 : vector<8x32xf32>
    %51 = arith.mulf %46, %50 : vector<8x32xf32>
    %52 = tpu.concatenate %51, %23 in 1 : vector<8x32xf32>, vector<8x32xf32> -> vector<8x64xf32>
    %cst_25 = arith.constant dense<0.000000e+00> : vector<8x256xf32>
    %53 = tpu.matmul %52, %10, %cst_25 {dimension_numbers = #tpu.dot_dimension_numbers<[1], [0], [0], [1], [0, 0, 1, 1], [], []>} : vector<8x64xf32>, vector<64x256xf32>, vector<8x256xf32> -> vector<8x256xf32>
    %54 = vector.extract_strided_slice %53 {offsets = [0, 0], sizes = [8, 128], strides = [1, 1]} : vector<8x256xf32> to vector<8x128xf32>
    %55 = vector.extract_strided_slice %53 {offsets = [0, 128], sizes = [8, 128], strides = [1, 1]} : vector<8x256xf32> to vector<8x128xf32>
    %56 = arith.addf %55, %13 : vector<8x128xf32>
    %57 = arith.addf %56, %56 : vector<8x128xf32>
    %58 = arith.select %19, %57, %56 : vector<8x128xi1>, vector<8x128xf32>
    %59 = arith.negf %58 : vector<8x128xf32>
    %60 = math.exp %59 : vector<8x128xf32>
    %cst_26 = arith.constant 1.000000e+00 : f32
    %61 = vector.broadcast %cst_26 : f32 to vector<8x128xf32>
    %62 = arith.addf %61, %60 : vector<8x128xf32>
    %63 = arith.divf %61, %62 : vector<8x128xf32>
    %64 = arith.addf %63, %63 : vector<8x128xf32>
    %cst_27 = arith.constant 1.000000e+00 : f32
    %65 = vector.broadcast %cst_27 : f32 to vector<8x128xf32>
    %66 = arith.subf %64, %65 : vector<8x128xf32>
    %67 = arith.select %19, %66, %63 : vector<8x128xi1>, vector<8x128xf32>
    %68 = vector.extract_strided_slice %67 {offsets = [0, 0], sizes = [8, 32], strides = [1, 1]} : vector<8x128xf32> to vector<8x32xf32>
    %69 = vector.extract_strided_slice %67 {offsets = [0, 32], sizes = [8, 32], strides = [1, 1]} : vector<8x128xf32> to vector<8x32xf32>
    %70 = vector.extract_strided_slice %67 {offsets = [0, 64], sizes = [8, 32], strides = [1, 1]} : vector<8x128xf32> to vector<8x32xf32>
    %71 = vector.extract_strided_slice %67 {offsets = [0, 96], sizes = [8, 32], strides = [1, 1]} : vector<8x128xf32> to vector<8x32xf32>
    %72 = arith.mulf %69, %25 : vector<8x32xf32>
    %73 = arith.mulf %68, %70 : vector<8x32xf32>
    %74 = arith.addf %72, %73 : vector<8x32xf32>
    %75 = math.tanh %74 : vector<8x32xf32>
    %76 = arith.mulf %71, %75 : vector<8x32xf32>
    %c1_i32 = arith.constant 1 : i32
    %c8_i32_28 = arith.constant 8 : i32
    %77 = arith.muli %c1_i32, %c8_i32_28 : i32
    %78 = tpu.assume_multiple %77, 8 : i32
    %79 = arith.index_cast %78 : i32 to index
    %c0_29 = arith.constant 0 : index
    %80 = vector.load %arg11[%79, %c0_29] : memref<64x128xf32, #tpu.memory_space<vmem>>, vector<8x128xf32>
    %81 = arith.addf %80, %54 : vector<8x128xf32>
    %82 = arith.addf %81, %81 : vector<8x128xf32>
    %83 = arith.select %19, %82, %81 : vector<8x128xi1>, vector<8x128xf32>
    %84 = arith.negf %83 : vector<8x128xf32>
    %85 = math.exp %84 : vector<8x128xf32>
    %cst_30 = arith.constant 1.000000e+00 : f32
    %86 = vector.broadcast %cst_30 : f32 to vector<8x128xf32>
    %87 = arith.addf %86, %85 : vector<8x128xf32>
    %88 = arith.divf %86, %87 : vector<8x128xf32>
    %89 = arith.addf %88, %88 : vector<8x128xf32>
    %cst_31 = arith.constant 1.000000e+00 : f32
    %90 = vector.broadcast %cst_31 : f32 to vector<8x128xf32>
    %91 = arith.subf %89, %90 : vector<8x128xf32>
    %92 = arith.select %19, %91, %88 : vector<8x128xi1>, vector<8x128xf32>
    %93 = vector.extract_strided_slice %92 {offsets = [0, 0], sizes = [8, 32], strides = [1, 1]} : vector<8x128xf32> to vector<8x32xf32>
    %94 = vector.extract_strided_slice %92 {offsets = [0, 32], sizes = [8, 32], strides = [1, 1]} : vector<8x128xf32> to vector<8x32xf32>
    %95 = vector.extract_strided_slice %92 {offsets = [0, 64], sizes = [8, 32], strides = [1, 1]} : vector<8x128xf32> to vector<8x32xf32>
    %96 = vector.extract_strided_slice %92 {offsets = [0, 96], sizes = [8, 32], strides = [1, 1]} : vector<8x128xf32> to vector<8x32xf32>
    %97 = arith.mulf %94, %49 : vector<8x32xf32>
    %98 = arith.mulf %93, %95 : vector<8x32xf32>
    %99 = arith.addf %97, %98 : vector<8x32xf32>
    %100 = math.tanh %99 : vector<8x32xf32>
    %101 = arith.mulf %96, %100 : vector<8x32xf32>
    %102 = tpu.concatenate %101, %76 in 1 : vector<8x32xf32>, vector<8x32xf32> -> vector<8x64xf32>
    %cst_32 = arith.constant dense<0.000000e+00> : vector<8x256xf32>
    %103 = tpu.matmul %102, %10, %cst_32 {dimension_numbers = #tpu.dot_dimension_numbers<[1], [0], [0], [1], [0, 0, 1, 1], [], []>} : vector<8x64xf32>, vector<64x256xf32>, vector<8x256xf32> -> vector<8x256xf32>
    %104 = vector.extract_strided_slice %103 {offsets = [0, 0], sizes = [8, 128], strides = [1, 1]} : vector<8x256xf32> to vector<8x128xf32>
    %105 = vector.extract_strided_slice %103 {offsets = [0, 128], sizes = [8, 128], strides = [1, 1]} : vector<8x256xf32> to vector<8x128xf32>
    %106 = arith.addf %105, %13 : vector<8x128xf32>
    %107 = arith.addf %106, %106 : vector<8x128xf32>
    %108 = arith.select %19, %107, %106 : vector<8x128xi1>, vector<8x128xf32>
    %109 = arith.negf %108 : vector<8x128xf32>
    %110 = math.exp %109 : vector<8x128xf32>
    %cst_33 = arith.constant 1.000000e+00 : f32
    %111 = vector.broadcast %cst_33 : f32 to vector<8x128xf32>
    %112 = arith.addf %111, %110 : vector<8x128xf32>
    %113 = arith.divf %111, %112 : vector<8x128xf32>
    %114 = arith.addf %113, %113 : vector<8x128xf32>
    %cst_34 = arith.constant 1.000000e+00 : f32
    %115 = vector.broadcast %cst_34 : f32 to vector<8x128xf32>
    %116 = arith.subf %114, %115 : vector<8x128xf32>
    %117 = arith.select %19, %116, %113 : vector<8x128xi1>, vector<8x128xf32>
    %118 = vector.extract_strided_slice %117 {offsets = [0, 0], sizes = [8, 32], strides = [1, 1]} : vector<8x128xf32> to vector<8x32xf32>
    %119 = vector.extract_strided_slice %117 {offsets = [0, 32], sizes = [8, 32], strides = [1, 1]} : vector<8x128xf32> to vector<8x32xf32>
    %120 = vector.extract_strided_slice %117 {offsets = [0, 64], sizes = [8, 32], strides = [1, 1]} : vector<8x128xf32> to vector<8x32xf32>
    %121 = vector.extract_strided_slice %117 {offsets = [0, 96], sizes = [8, 32], strides = [1, 1]} : vector<8x128xf32> to vector<8x32xf32>
    %122 = arith.mulf %119, %74 : vector<8x32xf32>
    %123 = arith.mulf %118, %120 : vector<8x32xf32>
    %124 = arith.addf %122, %123 : vector<8x32xf32>
    %125 = math.tanh %124 : vector<8x32xf32>
    %126 = arith.mulf %121, %125 : vector<8x32xf32>
    %c2_i32 = arith.constant 2 : i32
    %c8_i32_35 = arith.constant 8 : i32
    %127 = arith.muli %c2_i32, %c8_i32_35 : i32
    %128 = tpu.assume_multiple %127, 8 : i32
    %129 = arith.index_cast %128 : i32 to index
    %c0_36 = arith.constant 0 : index
    %130 = vector.load %arg11[%129, %c0_36] : memref<64x128xf32, #tpu.memory_space<vmem>>, vector<8x128xf32>
    %131 = arith.addf %130, %104 : vector<8x128xf32>
    %132 = arith.addf %131, %131 : vector<8x128xf32>
    %133 = arith.select %19, %132, %131 : vector<8x128xi1>, vector<8x128xf32>
    %134 = arith.negf %133 : vector<8x128xf32>
    %135 = math.exp %134 : vector<8x128xf32>
    %cst_37 = arith.constant 1.000000e+00 : f32
    %136 = vector.broadcast %cst_37 : f32 to vector<8x128xf32>
    %137 = arith.addf %136, %135 : vector<8x128xf32>
    %138 = arith.divf %136, %137 : vector<8x128xf32>
    %139 = arith.addf %138, %138 : vector<8x128xf32>
    %cst_38 = arith.constant 1.000000e+00 : f32
    %140 = vector.broadcast %cst_38 : f32 to vector<8x128xf32>
    %141 = arith.subf %139, %140 : vector<8x128xf32>
    %142 = arith.select %19, %141, %138 : vector<8x128xi1>, vector<8x128xf32>
    %143 = vector.extract_strided_slice %142 {offsets = [0, 0], sizes = [8, 32], strides = [1, 1]} : vector<8x128xf32> to vector<8x32xf32>
    %144 = vector.extract_strided_slice %142 {offsets = [0, 32], sizes = [8, 32], strides = [1, 1]} : vector<8x128xf32> to vector<8x32xf32>
    %145 = vector.extract_strided_slice %142 {offsets = [0, 64], sizes = [8, 32], strides = [1, 1]} : vector<8x128xf32> to vector<8x32xf32>
    %146 = vector.extract_strided_slice %142 {offsets = [0, 96], sizes = [8, 32], strides = [1, 1]} : vector<8x128xf32> to vector<8x32xf32>
    %147 = arith.mulf %144, %99 : vector<8x32xf32>
    %148 = arith.mulf %143, %145 : vector<8x32xf32>
    %149 = arith.addf %147, %148 : vector<8x32xf32>
    %150 = math.tanh %149 : vector<8x32xf32>
    %151 = arith.mulf %146, %150 : vector<8x32xf32>
    %152 = tpu.concatenate %151, %126 in 1 : vector<8x32xf32>, vector<8x32xf32> -> vector<8x64xf32>
    %cst_39 = arith.constant dense<0.000000e+00> : vector<8x256xf32>
    %153 = tpu.matmul %152, %10, %cst_39 {dimension_numbers = #tpu.dot_dimension_numbers<[1], [0], [0], [1], [0, 0, 1, 1], [], []>} : vector<8x64xf32>, vector<64x256xf32>, vector<8x256xf32> -> vector<8x256xf32>
    %154 = vector.extract_strided_slice %153 {offsets = [0, 0], sizes = [8, 128], strides = [1, 1]} : vector<8x256xf32> to vector<8x128xf32>
    %155 = vector.extract_strided_slice %153 {offsets = [0, 128], sizes = [8, 128], strides = [1, 1]} : vector<8x256xf32> to vector<8x128xf32>
    %156 = arith.addf %155, %13 : vector<8x128xf32>
    %157 = arith.addf %156, %156 : vector<8x128xf32>
    %158 = arith.select %19, %157, %156 : vector<8x128xi1>, vector<8x128xf32>
    %159 = arith.negf %158 : vector<8x128xf32>
    %160 = math.exp %159 : vector<8x128xf32>
    %cst_40 = arith.constant 1.000000e+00 : f32
    %161 = vector.broadcast %cst_40 : f32 to vector<8x128xf32>
    %162 = arith.addf %161, %160 : vector<8x128xf32>
    %163 = arith.divf %161, %162 : vector<8x128xf32>
    %164 = arith.addf %163, %163 : vector<8x128xf32>
    %cst_41 = arith.constant 1.000000e+00 : f32
    %165 = vector.broadcast %cst_41 : f32 to vector<8x128xf32>
    %166 = arith.subf %164, %165 : vector<8x128xf32>
    %167 = arith.select %19, %166, %163 : vector<8x128xi1>, vector<8x128xf32>
    %168 = vector.extract_strided_slice %167 {offsets = [0, 0], sizes = [8, 32], strides = [1, 1]} : vector<8x128xf32> to vector<8x32xf32>
    %169 = vector.extract_strided_slice %167 {offsets = [0, 32], sizes = [8, 32], strides = [1, 1]} : vector<8x128xf32> to vector<8x32xf32>
    %170 = vector.extract_strided_slice %167 {offsets = [0, 64], sizes = [8, 32], strides = [1, 1]} : vector<8x128xf32> to vector<8x32xf32>
    %171 = vector.extract_strided_slice %167 {offsets = [0, 96], sizes = [8, 32], strides = [1, 1]} : vector<8x128xf32> to vector<8x32xf32>
    %172 = arith.mulf %169, %124 : vector<8x32xf32>
    %173 = arith.mulf %168, %170 : vector<8x32xf32>
    %174 = arith.addf %172, %173 : vector<8x32xf32>
    %175 = math.tanh %174 : vector<8x32xf32>
    %176 = arith.mulf %171, %175 : vector<8x32xf32>
    %c3_i32 = arith.constant 3 : i32
    %c8_i32_42 = arith.constant 8 : i32
    %177 = arith.muli %c3_i32, %c8_i32_42 : i32
    %178 = tpu.assume_multiple %177, 8 : i32
    %179 = arith.index_cast %178 : i32 to index
    %c0_43 = arith.constant 0 : index
    %180 = vector.load %arg11[%179, %c0_43] : memref<64x128xf32, #tpu.memory_space<vmem>>, vector<8x128xf32>
    %181 = arith.addf %180, %154 : vector<8x128xf32>
    %182 = arith.addf %181, %181 : vector<8x128xf32>
    %183 = arith.select %19, %182, %181 : vector<8x128xi1>, vector<8x128xf32>
    %184 = arith.negf %183 : vector<8x128xf32>
    %185 = math.exp %184 : vector<8x128xf32>
    %cst_44 = arith.constant 1.000000e+00 : f32
    %186 = vector.broadcast %cst_44 : f32 to vector<8x128xf32>
    %187 = arith.addf %186, %185 : vector<8x128xf32>
    %188 = arith.divf %186, %187 : vector<8x128xf32>
    %189 = arith.addf %188, %188 : vector<8x128xf32>
    %cst_45 = arith.constant 1.000000e+00 : f32
    %190 = vector.broadcast %cst_45 : f32 to vector<8x128xf32>
    %191 = arith.subf %189, %190 : vector<8x128xf32>
    %192 = arith.select %19, %191, %188 : vector<8x128xi1>, vector<8x128xf32>
    %193 = vector.extract_strided_slice %192 {offsets = [0, 0], sizes = [8, 32], strides = [1, 1]} : vector<8x128xf32> to vector<8x32xf32>
    %194 = vector.extract_strided_slice %192 {offsets = [0, 32], sizes = [8, 32], strides = [1, 1]} : vector<8x128xf32> to vector<8x32xf32>
    %195 = vector.extract_strided_slice %192 {offsets = [0, 64], sizes = [8, 32], strides = [1, 1]} : vector<8x128xf32> to vector<8x32xf32>
    %196 = vector.extract_strided_slice %192 {offsets = [0, 96], sizes = [8, 32], strides = [1, 1]} : vector<8x128xf32> to vector<8x32xf32>
    %197 = arith.mulf %194, %149 : vector<8x32xf32>
    %198 = arith.mulf %193, %195 : vector<8x32xf32>
    %199 = arith.addf %197, %198 : vector<8x32xf32>
    %200 = math.tanh %199 : vector<8x32xf32>
    %201 = arith.mulf %196, %200 : vector<8x32xf32>
    %202 = tpu.concatenate %201, %176 in 1 : vector<8x32xf32>, vector<8x32xf32> -> vector<8x64xf32>
    %cst_46 = arith.constant dense<0.000000e+00> : vector<8x256xf32>
    %203 = tpu.matmul %202, %10, %cst_46 {dimension_numbers = #tpu.dot_dimension_numbers<[1], [0], [0], [1], [0, 0, 1, 1], [], []>} : vector<8x64xf32>, vector<64x256xf32>, vector<8x256xf32> -> vector<8x256xf32>
    %204 = vector.extract_strided_slice %203 {offsets = [0, 0], sizes = [8, 128], strides = [1, 1]} : vector<8x256xf32> to vector<8x128xf32>
    %205 = vector.extract_strided_slice %203 {offsets = [0, 128], sizes = [8, 128], strides = [1, 1]} : vector<8x256xf32> to vector<8x128xf32>
    %206 = arith.addf %205, %13 : vector<8x128xf32>
    %207 = arith.addf %206, %206 : vector<8x128xf32>
    %208 = arith.select %19, %207, %206 : vector<8x128xi1>, vector<8x128xf32>
    %209 = arith.negf %208 : vector<8x128xf32>
    %210 = math.exp %209 : vector<8x128xf32>
    %cst_47 = arith.constant 1.000000e+00 : f32
    %211 = vector.broadcast %cst_47 : f32 to vector<8x128xf32>
    %212 = arith.addf %211, %210 : vector<8x128xf32>
    %213 = arith.divf %211, %212 : vector<8x128xf32>
    %214 = arith.addf %213, %213 : vector<8x128xf32>
    %cst_48 = arith.constant 1.000000e+00 : f32
    %215 = vector.broadcast %cst_48 : f32 to vector<8x128xf32>
    %216 = arith.subf %214, %215 : vector<8x128xf32>
    %217 = arith.select %19, %216, %213 : vector<8x128xi1>, vector<8x128xf32>
    %218 = vector.extract_strided_slice %217 {offsets = [0, 0], sizes = [8, 32], strides = [1, 1]} : vector<8x128xf32> to vector<8x32xf32>
    %219 = vector.extract_strided_slice %217 {offsets = [0, 32], sizes = [8, 32], strides = [1, 1]} : vector<8x128xf32> to vector<8x32xf32>
    %220 = vector.extract_strided_slice %217 {offsets = [0, 64], sizes = [8, 32], strides = [1, 1]} : vector<8x128xf32> to vector<8x32xf32>
    %221 = vector.extract_strided_slice %217 {offsets = [0, 96], sizes = [8, 32], strides = [1, 1]} : vector<8x128xf32> to vector<8x32xf32>
    %222 = arith.mulf %219, %174 : vector<8x32xf32>
    %223 = arith.mulf %218, %220 : vector<8x32xf32>
    %224 = arith.addf %222, %223 : vector<8x32xf32>
    %225 = math.tanh %224 : vector<8x32xf32>
    %226 = arith.mulf %221, %225 : vector<8x32xf32>
    %c4_i32 = arith.constant 4 : i32
    %c8_i32_49 = arith.constant 8 : i32
    %227 = arith.muli %c4_i32, %c8_i32_49 : i32
    %228 = tpu.assume_multiple %227, 8 : i32
    %229 = arith.index_cast %228 : i32 to index
    %c0_50 = arith.constant 0 : index
    %230 = vector.load %arg11[%229, %c0_50] : memref<64x128xf32, #tpu.memory_space<vmem>>, vector<8x128xf32>
    %231 = arith.addf %230, %204 : vector<8x128xf32>
    %232 = arith.addf %231, %231 : vector<8x128xf32>
    %233 = arith.select %19, %232, %231 : vector<8x128xi1>, vector<8x128xf32>
    %234 = arith.negf %233 : vector<8x128xf32>
    %235 = math.exp %234 : vector<8x128xf32>
    %cst_51 = arith.constant 1.000000e+00 : f32
    %236 = vector.broadcast %cst_51 : f32 to vector<8x128xf32>
    %237 = arith.addf %236, %235 : vector<8x128xf32>
    %238 = arith.divf %236, %237 : vector<8x128xf32>
    %239 = arith.addf %238, %238 : vector<8x128xf32>
    %cst_52 = arith.constant 1.000000e+00 : f32
    %240 = vector.broadcast %cst_52 : f32 to vector<8x128xf32>
    %241 = arith.subf %239, %240 : vector<8x128xf32>
    %242 = arith.select %19, %241, %238 : vector<8x128xi1>, vector<8x128xf32>
    %243 = vector.extract_strided_slice %242 {offsets = [0, 0], sizes = [8, 32], strides = [1, 1]} : vector<8x128xf32> to vector<8x32xf32>
    %244 = vector.extract_strided_slice %242 {offsets = [0, 32], sizes = [8, 32], strides = [1, 1]} : vector<8x128xf32> to vector<8x32xf32>
    %245 = vector.extract_strided_slice %242 {offsets = [0, 64], sizes = [8, 32], strides = [1, 1]} : vector<8x128xf32> to vector<8x32xf32>
    %246 = vector.extract_strided_slice %242 {offsets = [0, 96], sizes = [8, 32], strides = [1, 1]} : vector<8x128xf32> to vector<8x32xf32>
    %247 = arith.mulf %244, %199 : vector<8x32xf32>
    %248 = arith.mulf %243, %245 : vector<8x32xf32>
    %249 = arith.addf %247, %248 : vector<8x32xf32>
    %250 = math.tanh %249 : vector<8x32xf32>
    %251 = arith.mulf %246, %250 : vector<8x32xf32>
    %252 = tpu.concatenate %251, %226 in 1 : vector<8x32xf32>, vector<8x32xf32> -> vector<8x64xf32>
    %cst_53 = arith.constant dense<0.000000e+00> : vector<8x256xf32>
    %253 = tpu.matmul %252, %10, %cst_53 {dimension_numbers = #tpu.dot_dimension_numbers<[1], [0], [0], [1], [0, 0, 1, 1], [], []>} : vector<8x64xf32>, vector<64x256xf32>, vector<8x256xf32> -> vector<8x256xf32>
    %254 = vector.extract_strided_slice %253 {offsets = [0, 0], sizes = [8, 128], strides = [1, 1]} : vector<8x256xf32> to vector<8x128xf32>
    %255 = vector.extract_strided_slice %253 {offsets = [0, 128], sizes = [8, 128], strides = [1, 1]} : vector<8x256xf32> to vector<8x128xf32>
    %256 = arith.addf %255, %13 : vector<8x128xf32>
    %257 = arith.addf %256, %256 : vector<8x128xf32>
    %258 = arith.select %19, %257, %256 : vector<8x128xi1>, vector<8x128xf32>
    %259 = arith.negf %258 : vector<8x128xf32>
    %260 = math.exp %259 : vector<8x128xf32>
    %cst_54 = arith.constant 1.000000e+00 : f32
    %261 = vector.broadcast %cst_54 : f32 to vector<8x128xf32>
    %262 = arith.addf %261, %260 : vector<8x128xf32>
    %263 = arith.divf %261, %262 : vector<8x128xf32>
    %264 = arith.addf %263, %263 : vector<8x128xf32>
    %cst_55 = arith.constant 1.000000e+00 : f32
    %265 = vector.broadcast %cst_55 : f32 to vector<8x128xf32>
    %266 = arith.subf %264, %265 : vector<8x128xf32>
    %267 = arith.select %19, %266, %263 : vector<8x128xi1>, vector<8x128xf32>
    %268 = vector.extract_strided_slice %267 {offsets = [0, 0], sizes = [8, 32], strides = [1, 1]} : vector<8x128xf32> to vector<8x32xf32>
    %269 = vector.extract_strided_slice %267 {offsets = [0, 32], sizes = [8, 32], strides = [1, 1]} : vector<8x128xf32> to vector<8x32xf32>
    %270 = vector.extract_strided_slice %267 {offsets = [0, 64], sizes = [8, 32], strides = [1, 1]} : vector<8x128xf32> to vector<8x32xf32>
    %271 = vector.extract_strided_slice %267 {offsets = [0, 96], sizes = [8, 32], strides = [1, 1]} : vector<8x128xf32> to vector<8x32xf32>
    %272 = arith.mulf %269, %224 : vector<8x32xf32>
    %273 = arith.mulf %268, %270 : vector<8x32xf32>
    %274 = arith.addf %272, %273 : vector<8x32xf32>
    %275 = math.tanh %274 : vector<8x32xf32>
    %276 = arith.mulf %271, %275 : vector<8x32xf32>
    %c5_i32 = arith.constant 5 : i32
    %c8_i32_56 = arith.constant 8 : i32
    %277 = arith.muli %c5_i32, %c8_i32_56 : i32
    %278 = tpu.assume_multiple %277, 8 : i32
    %279 = arith.index_cast %278 : i32 to index
    %c0_57 = arith.constant 0 : index
    %280 = vector.load %arg11[%279, %c0_57] : memref<64x128xf32, #tpu.memory_space<vmem>>, vector<8x128xf32>
    %281 = arith.addf %280, %254 : vector<8x128xf32>
    %282 = arith.addf %281, %281 : vector<8x128xf32>
    %283 = arith.select %19, %282, %281 : vector<8x128xi1>, vector<8x128xf32>
    %284 = arith.negf %283 : vector<8x128xf32>
    %285 = math.exp %284 : vector<8x128xf32>
    %cst_58 = arith.constant 1.000000e+00 : f32
    %286 = vector.broadcast %cst_58 : f32 to vector<8x128xf32>
    %287 = arith.addf %286, %285 : vector<8x128xf32>
    %288 = arith.divf %286, %287 : vector<8x128xf32>
    %289 = arith.addf %288, %288 : vector<8x128xf32>
    %cst_59 = arith.constant 1.000000e+00 : f32
    %290 = vector.broadcast %cst_59 : f32 to vector<8x128xf32>
    %291 = arith.subf %289, %290 : vector<8x128xf32>
    %292 = arith.select %19, %291, %288 : vector<8x128xi1>, vector<8x128xf32>
    %293 = vector.extract_strided_slice %292 {offsets = [0, 0], sizes = [8, 32], strides = [1, 1]} : vector<8x128xf32> to vector<8x32xf32>
    %294 = vector.extract_strided_slice %292 {offsets = [0, 32], sizes = [8, 32], strides = [1, 1]} : vector<8x128xf32> to vector<8x32xf32>
    %295 = vector.extract_strided_slice %292 {offsets = [0, 64], sizes = [8, 32], strides = [1, 1]} : vector<8x128xf32> to vector<8x32xf32>
    %296 = vector.extract_strided_slice %292 {offsets = [0, 96], sizes = [8, 32], strides = [1, 1]} : vector<8x128xf32> to vector<8x32xf32>
    %297 = arith.mulf %294, %249 : vector<8x32xf32>
    %298 = arith.mulf %293, %295 : vector<8x32xf32>
    %299 = arith.addf %297, %298 : vector<8x32xf32>
    %300 = math.tanh %299 : vector<8x32xf32>
    %301 = arith.mulf %296, %300 : vector<8x32xf32>
    %302 = tpu.concatenate %301, %276 in 1 : vector<8x32xf32>, vector<8x32xf32> -> vector<8x64xf32>
    %cst_60 = arith.constant dense<0.000000e+00> : vector<8x256xf32>
    %303 = tpu.matmul %302, %10, %cst_60 {dimension_numbers = #tpu.dot_dimension_numbers<[1], [0], [0], [1], [0, 0, 1, 1], [], []>} : vector<8x64xf32>, vector<64x256xf32>, vector<8x256xf32> -> vector<8x256xf32>
    %304 = vector.extract_strided_slice %303 {offsets = [0, 0], sizes = [8, 128], strides = [1, 1]} : vector<8x256xf32> to vector<8x128xf32>
    %305 = vector.extract_strided_slice %303 {offsets = [0, 128], sizes = [8, 128], strides = [1, 1]} : vector<8x256xf32> to vector<8x128xf32>
    %306 = arith.addf %305, %13 : vector<8x128xf32>
    %307 = arith.addf %306, %306 : vector<8x128xf32>
    %308 = arith.select %19, %307, %306 : vector<8x128xi1>, vector<8x128xf32>
    %309 = arith.negf %308 : vector<8x128xf32>
    %310 = math.exp %309 : vector<8x128xf32>
    %cst_61 = arith.constant 1.000000e+00 : f32
    %311 = vector.broadcast %cst_61 : f32 to vector<8x128xf32>
    %312 = arith.addf %311, %310 : vector<8x128xf32>
    %313 = arith.divf %311, %312 : vector<8x128xf32>
    %314 = arith.addf %313, %313 : vector<8x128xf32>
    %cst_62 = arith.constant 1.000000e+00 : f32
    %315 = vector.broadcast %cst_62 : f32 to vector<8x128xf32>
    %316 = arith.subf %314, %315 : vector<8x128xf32>
    %317 = arith.select %19, %316, %313 : vector<8x128xi1>, vector<8x128xf32>
    %318 = vector.extract_strided_slice %317 {offsets = [0, 0], sizes = [8, 32], strides = [1, 1]} : vector<8x128xf32> to vector<8x32xf32>
    %319 = vector.extract_strided_slice %317 {offsets = [0, 32], sizes = [8, 32], strides = [1, 1]} : vector<8x128xf32> to vector<8x32xf32>
    %320 = vector.extract_strided_slice %317 {offsets = [0, 64], sizes = [8, 32], strides = [1, 1]} : vector<8x128xf32> to vector<8x32xf32>
    %321 = vector.extract_strided_slice %317 {offsets = [0, 96], sizes = [8, 32], strides = [1, 1]} : vector<8x128xf32> to vector<8x32xf32>
    %322 = arith.mulf %319, %274 : vector<8x32xf32>
    %323 = arith.mulf %318, %320 : vector<8x32xf32>
    %324 = arith.addf %322, %323 : vector<8x32xf32>
    %325 = math.tanh %324 : vector<8x32xf32>
    %326 = arith.mulf %321, %325 : vector<8x32xf32>
    %c6_i32 = arith.constant 6 : i32
    %c8_i32_63 = arith.constant 8 : i32
    %327 = arith.muli %c6_i32, %c8_i32_63 : i32
    %328 = tpu.assume_multiple %327, 8 : i32
    %329 = arith.index_cast %328 : i32 to index
    %c0_64 = arith.constant 0 : index
    %330 = vector.load %arg11[%329, %c0_64] : memref<64x128xf32, #tpu.memory_space<vmem>>, vector<8x128xf32>
    %331 = arith.addf %330, %304 : vector<8x128xf32>
    %332 = arith.addf %331, %331 : vector<8x128xf32>
    %333 = arith.select %19, %332, %331 : vector<8x128xi1>, vector<8x128xf32>
    %334 = arith.negf %333 : vector<8x128xf32>
    %335 = math.exp %334 : vector<8x128xf32>
    %cst_65 = arith.constant 1.000000e+00 : f32
    %336 = vector.broadcast %cst_65 : f32 to vector<8x128xf32>
    %337 = arith.addf %336, %335 : vector<8x128xf32>
    %338 = arith.divf %336, %337 : vector<8x128xf32>
    %339 = arith.addf %338, %338 : vector<8x128xf32>
    %cst_66 = arith.constant 1.000000e+00 : f32
    %340 = vector.broadcast %cst_66 : f32 to vector<8x128xf32>
    %341 = arith.subf %339, %340 : vector<8x128xf32>
    %342 = arith.select %19, %341, %338 : vector<8x128xi1>, vector<8x128xf32>
    %343 = vector.extract_strided_slice %342 {offsets = [0, 0], sizes = [8, 32], strides = [1, 1]} : vector<8x128xf32> to vector<8x32xf32>
    %344 = vector.extract_strided_slice %342 {offsets = [0, 32], sizes = [8, 32], strides = [1, 1]} : vector<8x128xf32> to vector<8x32xf32>
    %345 = vector.extract_strided_slice %342 {offsets = [0, 64], sizes = [8, 32], strides = [1, 1]} : vector<8x128xf32> to vector<8x32xf32>
    %346 = vector.extract_strided_slice %342 {offsets = [0, 96], sizes = [8, 32], strides = [1, 1]} : vector<8x128xf32> to vector<8x32xf32>
    %347 = arith.mulf %344, %299 : vector<8x32xf32>
    %348 = arith.mulf %343, %345 : vector<8x32xf32>
    %349 = arith.addf %347, %348 : vector<8x32xf32>
    %350 = math.tanh %349 : vector<8x32xf32>
    %351 = arith.mulf %346, %350 : vector<8x32xf32>
    %352 = tpu.concatenate %351, %326 in 1 : vector<8x32xf32>, vector<8x32xf32> -> vector<8x64xf32>
    %cst_67 = arith.constant dense<0.000000e+00> : vector<8x256xf32>
    %353 = tpu.matmul %352, %10, %cst_67 {dimension_numbers = #tpu.dot_dimension_numbers<[1], [0], [0], [1], [0, 0, 1, 1], [], []>} : vector<8x64xf32>, vector<64x256xf32>, vector<8x256xf32> -> vector<8x256xf32>
    %354 = vector.extract_strided_slice %353 {offsets = [0, 0], sizes = [8, 128], strides = [1, 1]} : vector<8x256xf32> to vector<8x128xf32>
    %355 = vector.extract_strided_slice %353 {offsets = [0, 128], sizes = [8, 128], strides = [1, 1]} : vector<8x256xf32> to vector<8x128xf32>
    %356 = arith.addf %355, %13 : vector<8x128xf32>
    %357 = arith.addf %356, %356 : vector<8x128xf32>
    %358 = arith.select %19, %357, %356 : vector<8x128xi1>, vector<8x128xf32>
    %359 = arith.negf %358 : vector<8x128xf32>
    %360 = math.exp %359 : vector<8x128xf32>
    %cst_68 = arith.constant 1.000000e+00 : f32
    %361 = vector.broadcast %cst_68 : f32 to vector<8x128xf32>
    %362 = arith.addf %361, %360 : vector<8x128xf32>
    %363 = arith.divf %361, %362 : vector<8x128xf32>
    %364 = arith.addf %363, %363 : vector<8x128xf32>
    %cst_69 = arith.constant 1.000000e+00 : f32
    %365 = vector.broadcast %cst_69 : f32 to vector<8x128xf32>
    %366 = arith.subf %364, %365 : vector<8x128xf32>
    %367 = arith.select %19, %366, %363 : vector<8x128xi1>, vector<8x128xf32>
    %368 = vector.extract_strided_slice %367 {offsets = [0, 0], sizes = [8, 32], strides = [1, 1]} : vector<8x128xf32> to vector<8x32xf32>
    %369 = vector.extract_strided_slice %367 {offsets = [0, 32], sizes = [8, 32], strides = [1, 1]} : vector<8x128xf32> to vector<8x32xf32>
    %370 = vector.extract_strided_slice %367 {offsets = [0, 64], sizes = [8, 32], strides = [1, 1]} : vector<8x128xf32> to vector<8x32xf32>
    %371 = vector.extract_strided_slice %367 {offsets = [0, 96], sizes = [8, 32], strides = [1, 1]} : vector<8x128xf32> to vector<8x32xf32>
    %372 = arith.mulf %369, %324 : vector<8x32xf32>
    %373 = arith.mulf %368, %370 : vector<8x32xf32>
    %374 = arith.addf %372, %373 : vector<8x32xf32>
    %375 = math.tanh %374 : vector<8x32xf32>
    %376 = arith.mulf %371, %375 : vector<8x32xf32>
    %c7_i32 = arith.constant 7 : i32
    %c8_i32_70 = arith.constant 8 : i32
    %377 = arith.muli %c7_i32, %c8_i32_70 : i32
    %378 = tpu.assume_multiple %377, 8 : i32
    %379 = arith.index_cast %378 : i32 to index
    %c0_71 = arith.constant 0 : index
    %380 = vector.load %arg11[%379, %c0_71] : memref<64x128xf32, #tpu.memory_space<vmem>>, vector<8x128xf32>
    %381 = arith.addf %380, %354 : vector<8x128xf32>
    %382 = arith.addf %381, %381 : vector<8x128xf32>
    %383 = arith.select %19, %382, %381 : vector<8x128xi1>, vector<8x128xf32>
    %384 = arith.negf %383 : vector<8x128xf32>
    %385 = math.exp %384 : vector<8x128xf32>
    %cst_72 = arith.constant 1.000000e+00 : f32
    %386 = vector.broadcast %cst_72 : f32 to vector<8x128xf32>
    %387 = arith.addf %386, %385 : vector<8x128xf32>
    %388 = arith.divf %386, %387 : vector<8x128xf32>
    %389 = arith.addf %388, %388 : vector<8x128xf32>
    %cst_73 = arith.constant 1.000000e+00 : f32
    %390 = vector.broadcast %cst_73 : f32 to vector<8x128xf32>
    %391 = arith.subf %389, %390 : vector<8x128xf32>
    %392 = arith.select %19, %391, %388 : vector<8x128xi1>, vector<8x128xf32>
    %393 = vector.extract_strided_slice %392 {offsets = [0, 0], sizes = [8, 32], strides = [1, 1]} : vector<8x128xf32> to vector<8x32xf32>
    %394 = vector.extract_strided_slice %392 {offsets = [0, 32], sizes = [8, 32], strides = [1, 1]} : vector<8x128xf32> to vector<8x32xf32>
    %395 = vector.extract_strided_slice %392 {offsets = [0, 64], sizes = [8, 32], strides = [1, 1]} : vector<8x128xf32> to vector<8x32xf32>
    %396 = vector.extract_strided_slice %392 {offsets = [0, 96], sizes = [8, 32], strides = [1, 1]} : vector<8x128xf32> to vector<8x32xf32>
    %397 = arith.mulf %394, %349 : vector<8x32xf32>
    %398 = arith.mulf %393, %395 : vector<8x32xf32>
    %399 = arith.addf %397, %398 : vector<8x32xf32>
    %400 = math.tanh %399 : vector<8x32xf32>
    %401 = arith.mulf %396, %400 : vector<8x32xf32>
    %402 = tpu.concatenate %401, %376 in 1 : vector<8x32xf32>, vector<8x32xf32> -> vector<8x64xf32>
    %cst_74 = arith.constant dense<0.000000e+00> : vector<8x256xf32>
    %403 = tpu.matmul %402, %10, %cst_74 {dimension_numbers = #tpu.dot_dimension_numbers<[1], [0], [0], [1], [0, 0, 1, 1], [], []>} : vector<8x64xf32>, vector<64x256xf32>, vector<8x256xf32> -> vector<8x256xf32>
    %404 = vector.extract_strided_slice %403 {offsets = [0, 0], sizes = [8, 128], strides = [1, 1]} : vector<8x256xf32> to vector<8x128xf32>
    %405 = vector.extract_strided_slice %403 {offsets = [0, 128], sizes = [8, 128], strides = [1, 1]} : vector<8x256xf32> to vector<8x128xf32>
    %406 = arith.addf %405, %13 : vector<8x128xf32>
    %407 = arith.addf %406, %406 : vector<8x128xf32>
    %408 = arith.select %19, %407, %406 : vector<8x128xi1>, vector<8x128xf32>
    %409 = arith.negf %408 : vector<8x128xf32>
    %410 = math.exp %409 : vector<8x128xf32>
    %cst_75 = arith.constant 1.000000e+00 : f32
    %411 = vector.broadcast %cst_75 : f32 to vector<8x128xf32>
    %412 = arith.addf %411, %410 : vector<8x128xf32>
    %413 = arith.divf %411, %412 : vector<8x128xf32>
    %414 = arith.addf %413, %413 : vector<8x128xf32>
    %cst_76 = arith.constant 1.000000e+00 : f32
    %415 = vector.broadcast %cst_76 : f32 to vector<8x128xf32>
    %416 = arith.subf %414, %415 : vector<8x128xf32>
    %417 = arith.select %19, %416, %413 : vector<8x128xi1>, vector<8x128xf32>
    %418 = vector.extract_strided_slice %417 {offsets = [0, 0], sizes = [8, 32], strides = [1, 1]} : vector<8x128xf32> to vector<8x32xf32>
    %419 = vector.extract_strided_slice %417 {offsets = [0, 32], sizes = [8, 32], strides = [1, 1]} : vector<8x128xf32> to vector<8x32xf32>
    %420 = vector.extract_strided_slice %417 {offsets = [0, 64], sizes = [8, 32], strides = [1, 1]} : vector<8x128xf32> to vector<8x32xf32>
    %421 = vector.extract_strided_slice %417 {offsets = [0, 96], sizes = [8, 32], strides = [1, 1]} : vector<8x128xf32> to vector<8x32xf32>
    %422 = arith.mulf %419, %374 : vector<8x32xf32>
    %423 = arith.mulf %418, %420 : vector<8x32xf32>
    %424 = arith.addf %422, %423 : vector<8x32xf32>
    %425 = math.tanh %424 : vector<8x32xf32>
    %426 = arith.mulf %421, %425 : vector<8x32xf32>
    %c8_i32_77 = arith.constant 8 : i32
    %c0_78 = arith.constant 0 : index
    %c0_79 = arith.constant 0 : index
    %c0_80 = arith.constant 0 : index
    %427 = vector.load %arg12[%c0_78, %c0_79, %c0_80] : memref<3x8x32xf32, #tpu.memory_space<vmem>>, vector<1x8x32xf32>
    %428 = vector.shape_cast %427 : vector<1x8x32xf32> to vector<8x32xf32>
    %429 = vector.shape_cast %399 : vector<8x32xf32> to vector<1x8x32xf32>
    tpu.vector_store %arg12[%c0_78, %c0_79, %c0_80], %429 {strides = array<i32>} : memref<3x8x32xf32, #tpu.memory_space<vmem>>, vector<1x8x32xf32>,
    %c1_81 = arith.constant 1 : index
    %c0_82 = arith.constant 0 : index
    %c0_83 = arith.constant 0 : index
    %430 = vector.load %arg12[%c1_81, %c0_82, %c0_83] : memref<3x8x32xf32, #tpu.memory_space<vmem>>, vector<1x8x32xf32>
    %431 = vector.shape_cast %430 : vector<1x8x32xf32> to vector<8x32xf32>
    %432 = vector.shape_cast %426 : vector<8x32xf32> to vector<1x8x32xf32>
    tpu.vector_store %arg12[%c1_81, %c0_82, %c0_83], %432 {strides = array<i32>} : memref<3x8x32xf32, #tpu.memory_space<vmem>>, vector<1x8x32xf32>,
    %c2_84 = arith.constant 2 : index
    %c0_85 = arith.constant 0 : index
    %c0_86 = arith.constant 0 : index
    %433 = vector.load %arg12[%c2_84, %c0_85, %c0_86] : memref<3x8x32xf32, #tpu.memory_space<vmem>>, vector<1x8x32xf32>
    %434 = vector.shape_cast %433 : vector<1x8x32xf32> to vector<8x32xf32>
    %435 = vector.shape_cast %424 : vector<8x32xf32> to vector<1x8x32xf32>
    tpu.vector_store %arg12[%c2_84, %c0_85, %c0_86], %435 {strides = array<i32>} : memref<3x8x32xf32, #tpu.memory_space<vmem>>, vector<1x8x32xf32>,
    %c0_87 = arith.constant 0 : index
    %c0_88 = arith.constant 0 : index
    %436 = vector.load %arg13[%c0_87, %c0_88] : memref<8x128xf32, #tpu.memory_space<vmem>>, vector<8x128xf32>
    tpu.vector_store %arg13[%c0_87, %c0_88], %404 {strides = array<i32>} : memref<8x128xf32, #tpu.memory_space<vmem>>, vector<8x128xf32>,
    %c0_i32_89 = arith.constant 0 : i32
    %437 = arith.cmpi eq, %arg0, %c0_i32_89 : i32
    %438 = arith.extui %437 : i1 to i32
    %c0_i32_90 = arith.constant 0 : i32
    %439 = arith.cmpi ne, %438, %c0_i32_90 : i32
    scf.if %439 {
      %c0_91 = arith.constant 0 : index
      %c0_92 = arith.constant 0 : index
      %440 = vector.load %arg6[%c0_91, %c0_92] : memref<32x32xf32, #tpu.memory_space<vmem>>, vector<32x32xf32>
      %cst_93 = arith.constant dense<0.000000e+00> : vector<8x32xf32>
      %441 = tpu.matmul %426, %440, %cst_93 {dimension_numbers = #tpu.dot_dimension_numbers<[1], [0], [0], [1], [0, 0, 1, 1], [], []>} : vector<8x32xf32>, vector<32x32xf32>, vector<8x32xf32> -> vector<8x32xf32>
      %c0_94 = arith.constant 0 : index
      %c0_95 = arith.constant 0 : index
      %442 = vector.load %arg7[%c0_94, %c0_95] : memref<1x32xf32, #tpu.memory_space<vmem>>, vector<1x32xf32>
      %443 = vector.broadcast %442 : vector<1x32xf32> to vector<8x32xf32>
      %444 = arith.addf %441, %443 : vector<8x32xf32>
      %cst_96 = arith.constant 0.000000e+00 : f32
      %445 = vector.broadcast %cst_96 : f32 to vector<8x32xf32>
      %446 = arith.maximumf %444, %445 : vector<8x32xf32>
      %c0_97 = arith.constant 0 : index
      %c0_98 = arith.constant 0 : index
      %447 = vector.load %arg8[%c0_97, %c0_98] : memref<32x128xf32, #tpu.memory_space<vmem>>, vector<32x128xf32>
      %cst_99 = arith.constant dense<0.000000e+00> : vector<8x128xf32>
      %448 = tpu.matmul %446, %447, %cst_99 {dimension_numbers = #tpu.dot_dimension_numbers<[1], [0], [0], [1], [0, 0, 1, 1], [], []>} : vector<8x32xf32>, vector<32x128xf32>, vector<8x128xf32> -> vector<8x128xf32>
      %c0_100 = arith.constant 0 : index
      %c0_101 = arith.constant 0 : index
      %449 = vector.load %arg9[%c0_100, %c0_101] : memref<1x128xf32, #tpu.memory_space<vmem>>, vector<1x128xf32>
      %450 = vector.broadcast %449 : vector<1x128xf32> to vector<8x128xf32>
      %451 = arith.addf %448, %450 : vector<8x128xf32>
      %c0_102 = arith.constant 0 : index
      %c0_103 = arith.constant 0 : index
      %452 = vector.load %arg10[%c0_102, %c0_103] : memref<8x128xf32, #tpu.memory_space<vmem>>, vector<8x128xf32>
      tpu.vector_store %arg10[%c0_102, %c0_103], %451 {strides = array<i32>} : memref<8x128xf32, #tpu.memory_space<vmem>>, vector<8x128xf32>,
    } else {
    }
    return
  }
  func.func @transform_0(%arg0: i32) -> (i32, i32) {
    %c0_i32 = arith.constant 0 : i32
    %c0_i32_0 = arith.constant 0 : i32
    return %arg0, %c0_i32 : i32, i32
  }
  func.func @transform_1(%arg0: i32) -> (i32, i32) {
    %c0_i32 = arith.constant 0 : i32
    %c0_i32_0 = arith.constant 0 : i32
    %c0_i32_1 = arith.constant 0 : i32
    return %c0_i32, %c0_i32_0 : i32, i32
  }
  func.func @transform_2(%arg0: i32) -> (i32, i32) {
    %c0_i32 = arith.constant 0 : i32
    %c0_i32_0 = arith.constant 0 : i32
    %c0_i32_1 = arith.constant 0 : i32
    return %c0_i32, %c0_i32_0 : i32, i32
  }
  func.func @transform_3(%arg0: i32) -> (i32, i32) {
    %c0_i32 = arith.constant 0 : i32
    %c0_i32_0 = arith.constant 0 : i32
    %c0_i32_1 = arith.constant 0 : i32
    return %c0_i32, %c0_i32_0 : i32, i32
  }
  func.func @transform_4(%arg0: i32) -> (i32, i32) {
    %c0_i32 = arith.constant 0 : i32
    %c0_i32_0 = arith.constant 0 : i32
    %c0_i32_1 = arith.constant 0 : i32
    return %c0_i32, %c0_i32_0 : i32, i32
  }
  func.func @transform_5(%arg0: i32) -> (i32, i32) {
    %c0_i32 = arith.constant 0 : i32
    %c0_i32_0 = arith.constant 0 : i32
    %c0_i32_1 = arith.constant 0 : i32
    return %c0_i32, %c0_i32_0 : i32, i32
  }
  func.func @transform_6(%arg0: i32) -> (i32, i32) {
    %c0_i32 = arith.constant 0 : i32
    %c0_i32_0 = arith.constant 0 : i32
    %c0_i32_1 = arith.constant 0 : i32
    return %c0_i32, %c0_i32_0 : i32, i32
  }
  func.func @transform_7(%arg0: i32) -> (i32, i32) {
    %c0_i32 = arith.constant 0 : i32
    %c0_i32_0 = arith.constant 0 : i32
    %c0_i32_1 = arith.constant 0 : i32
    return %c0_i32, %c0_i32_0 : i32, i32
  }
  func.func @transform_8(%arg0: i32) -> (i32, i32) {
    %c0_i32 = arith.constant 0 : i32
    %c0_i32_0 = arith.constant 0 : i32
    %c0_i32_1 = arith.constant 0 : i32
    return %c0_i32, %c0_i32_0 : i32, i32
  }
  func.func @transform_9(%arg0: i32) -> (i32, i32) {
    %c0_i32 = arith.constant 0 : i32
    %c0_i32_0 = arith.constant 0 : i32
    %c0_i32_1 = arith.constant 0 : i32
    return %c0_i32, %c0_i32_0 : i32, i32
  }
}

</mosaic_0001>

<bundles_post_ra>
// kernel: tpu_custom_call.1
= control target key start
LH: loop header
LB: loop body
LE: loop exit
PB: predicated region body
PF: predicated region fallthrough
CT: control target
= control target key end

     0   :  { %14 = vsyncpa [#allocation6], 0  ;;  %s2481_s0 = inlined_call_operand.vmem [shape: f32[64,3], index: 0, kind: input, shape index: {}]   ;;  %s2482_s1 = inlined_call_operand.vmem [shape: f32[3,128], index: 1, kind: input, shape index: {}]   ;;  %s2483_s2 = inlined_call_operand.vmem [shape: f32[1,128], index: 2, kind: input, shape index: {}]   ;;  %s2484_s3 = inlined_call_operand.hbm [shape: f32[64,256], index: 3, kind: input, shape index: {}]   ;;  %s2485_s4 = inlined_call_operand.vmem [shape: f32[1,128], index: 4, kind: input, shape index: {}]   ;;  %s2486_s5 = inlined_call_operand.vmem [shape: f32[32,32], index: 5, kind: input, shape index: {}]   ;;  %s2487_s6 = inlined_call_operand.vmem [shape: f32[1,32], index: 6, kind: input, shape index: {}]   ;;  %s2488_s7 = inlined_call_operand.vmem [shape: f32[32,128], index: 7, kind: input, shape index: {}]   ;;  %s2489_s8 = inlined_call_operand.vmem [shape: f32[1,128], index: 8, kind: input, shape index: {}]   ;;  %s2490_s9 = inlined_call_operand.hbm [shape: f32[8,128], index: 9, kind: output, shape index: {}]  }
   0x1   :  { %15 = vsyncpa [#allocation7], 0  ;;  %s2008_s30 = smov [#allocation5]   ;;  %s1960_s13 = scalar_lea.hbm %s2484_s3, 2048 }
   0x2   :  { %s27_s10 = sshll.u32 %s2008_s30, 4  ;;  %p1961_p0 = scmp.ne.s32.totalorder %s2484_s3, %s1960_s13  ;;  %s28_s10 = int_to_ptr.vmem [resolvable:$true] %s27_s10 }
   0x3   :  { %p1964_p1 = scmp.lt.u32.totalorder %s1960_s13, %s2484_s3 }
   0x5   :  { %p1966_p2 = pnand %p1964_p1, %p1961_p0 }
   0x7   :  { %1969 = shalt.err (!%p1966_p2)
}
   0x8   :  { %s1970_s18 = scalar_lea.vmem %s28_s10, 2048  ;;  %p1975_p4 = scmp.lt.s32.totalorder %s28_s10, %s28_s10 }
   0x9   :  { %p1971_p3 = scmp.ne.s32.totalorder %s28_s10, %s1970_s18  ;;  %p1976_p5 = scmp.lt.s32.totalorder %s1970_s18, %s1970_s18 }
   0xb   :  { %p1977_p6 = por %p1976_p5, %p1975_p4 }
   0xd   :  { %p1978_p7 = pnand %p1977_p6, %p1971_p3 }
   0xf   :  { %1981 = shalt.err (!%p1978_p7)
}
  0x10   :  { %s2009_s19 = smov 256   ;;  %s2010_s20 = smov 16  }
  0x11   :  { %33 = dma.hbm_to_vmem [thread:$0]  %s2484_s3, 2048, %s28_s10, [#allocation6], %s2009_s19, %s2009_s19, %s2010_s20  }
  0x12   :  { %2004 = dma.done.wait [#allocation6], 2048  }
  0x13   :  { %2005 = vsyncadd [#allocation6], 4294965248  ;;  %vm97_vm0 = vcmask 1042432   ;;  %vm72_vm1 = vcmask 23552   ;;  %v64_v0 = vld [vmem:[%s2482_s1] sm:$0x7]  ;;  %v237_v4 = vlaneseq }
  0x14   :  { %v56_v1 = vld [vmem:[%s2481_s0] sm:$0xff]  ;;  %v57_v2 = vld [vmem:[%s2481_s0 + $0x8] sm:$0xff]  ;;  %1678 = vmatprep.subr.msk.mxu0 %vm97_vm0, %v64_v0  ;;  %vm51_vm2 = vcmask 261120   ;;  %v2011_v3 = vmov 0.0   ;;  %s2013_s29 = smov 32   ;;  %v217_v28 = vld [vmem:[#allocation5 + $0x18] sm:$0xff] }
  0x15   :  { %1680 = vmatprep.mubr.msk.f32.mxu0 %vm72_vm1, %v56_v1  ;;  %1679 = vmatpush3.msk.msra.mxu0 %vm97_vm0, %v64_v0  ;;  %52 = vst.msk [vmem:[#allocation3] sm:$0xff] %vm51_vm2, %v2011_v3  ;;  %53 = vst.msk [vmem:[#allocation3 + $0x8] sm:$0xff] %vm51_vm2, %v2011_v3  ;;  %v238_v5 = vand.u32 127, %v237_v4  ;;  %v2101_v6 = vld [vmem:[%s2483_s2] ss:$0 sm:$0xff]  ;;  %s2012_s2 = smov 64  }
  0x16   :  { %1681 = vmatmul.mubr.msk.f32.vlgmr.msra.gmra.mrb[0].mxu0 %vm72_vm1, %v57_v2  ;;  %54 = vst.msk [vmem:[#allocation3 + $0x10] sm:$0xff] %vm51_vm2, %v2011_v3  ;;  %360 = vmatprep.mubr.f32.mxu1 %v2011_v3  ;;  %v215_v27 = vld [vmem:[#allocation5 + $0x8] sm:$0xff]  ;;  %v214_v29 = vld [vmem:[#allocation5] sm:$0xff]  ;;  %v216_v31 = vld [vmem:[#allocation5 + $0x10] sm:$0xff]  ;;  %vm292_vm6 = vcmask 523264   ;;  %vm2015_vm7 = vmmov 0  }
  0x17   :  { %vm239_vm3 = vcmp.ge.s32.totalorder %v238_v5, 64  ;;  %vm240_vm4 = vcmp.lt.s32.totalorder %v238_v5, 96  ;;  %v2120_v30 = vpack.c.bf16 %v217_v28, %v215_v27  ;;  %v219_v32 = vld [vmem:[#allocation5 + $0x28] sm:$0xff]  ;;  %v221_v33 = vld [vmem:[#allocation5 + $0x38] sm:$0xff]  ;;  %v2122_v34 = vpack.c.bf16 %v216_v31, %v214_v29  ;;  %v218_v36 = vld [vmem:[#allocation5 + $0x20] sm:$0xff]  ;;  %s2016_s1 = smov 96  }
  0x18   :  { %vm2106_vm5 = vmand %vm239_vm3, %vm240_vm4  ;;  %v2124_v35 = vpack.c.bf16 %v221_v33, %v219_v32  ;;  %v220_v37 = vld [vmem:[#allocation5 + $0x30] sm:$0xff]  ;;  %v223_v38 = vld [vmem:[#allocation5 + $0x48] sm:$0xff]  ;;  %s2017_s16 = smov [#allocation8]  }
  0x19   :  { %1715 = vmatprep.subr.bf16.mxu1 %v2120_v30  ;;  %v225_v39 = vld [vmem:[#allocation5 + $0x58] sm:$0xff]  ;;  %1731 = vmatprep.subr.bf16.mxu0 %v2120_v30  ;;  %v2129_v40 = vpack.c.bf16 %v220_v37, %v218_v36  ;;  %v222_v42 = vld [vmem:[#allocation5 + $0x40] sm:$0xff]  ;;  %v224_v43 = vld [vmem:[#allocation5 + $0x50] sm:$0xff]  ;;  %s1595_s17 = sshll.u32 %s2017_s16, 4  ;;  %s1596_s17 = int_to_ptr.vmem [resolvable:$true] %s1595_s17 }
  0x1a   :  { %1717 = vmatpush1.bf16.msra.mxu1 %v2122_v34  ;;  %1733 = vmatpush1.bf16.msra.mxu0 %v2122_v34  ;;  %v2133_v41 = vpack.c.bf16 %v225_v39, %v223_v38  ;;  %v227_v44 = vld [vmem:[#allocation5 + $0x68] sm:$0xff]  ;;  %v229_v45 = vld [vmem:[#allocation5 + $0x78] sm:$0xff]  ;;  %v2137_v46 = vpack.c.bf16 %v224_v43, %v222_v42  ;;  %v226_v48 = vld [vmem:[#allocation5 + $0x60] sm:$0xff]  ;;  %p1987_p9 = scmp.lt.s32.totalorder %s1596_s17, %s1596_s17 }
  0x1b   :  { %1719 = vmatprep.subr.bf16.mxu1 %v2124_v35  ;;  %1735 = vmatprep.subr.bf16.mxu0 %v2124_v35  ;;  %v2141_v47 = vpack.c.bf16 %v229_v45, %v227_v44  ;;  %v228_v49 = vld [vmem:[#allocation5 + $0x70] sm:$0xff]  ;;  %v2173_v59 = vld [vmem:[%s2485_s4] ss:$0 sm:$0xff]  ;;  %v59_v38 = vld [vmem:[%s2481_s0 + $0x18] sm:$0xff] }
  0x1c   :  { %v242_v20 = vld [vmem:[#allocation3] sm:$0xff]  ;;  %v244_v51 = vld [vmem:[#allocation3 + $0x8] sm:$0xff]  ;;  %v2146_v52 = vpack.c.bf16 %v228_v49, %v226_v48  ;;  %v63_v43 = vld [vmem:[%s2481_s0 + $0x38] sm:$0xff] }
  0x1d   :  { %v58_v37 = vld [vmem:[%s2481_s0 + $0x10] sm:$0xff]  ;;  %v61_v39 = vld [vmem:[%s2481_s0 + $0x28] sm:$0xff] }
  0x1e   :  { %1721 = vmatpush1.bf16.msra.mxu1 %v2129_v40  ;;  %1737 = vmatpush1.bf16.msra.mxu0 %v2129_v40  ;;  %v62_v42 = vld [vmem:[%s2481_s0 + $0x30] sm:$0xff] }
  0x1f   :  { %1723 = vmatprep.subr.bf16.mxu1 %v2133_v41  ;;  %1739 = vmatprep.subr.bf16.mxu0 %v2133_v41  ;;  %v1422_v10 = vld [vmem:[%s2486_s5 + $0x10] sm:$0xff] }
  0x20   :  { %1683 = vmatprep.mubr.msk.f32.mxu0 %vm72_vm1, %v58_v37 }
  0x21   :  { %1684 = vmatmul.mubr.msk.f32.gmra.mrb[2].mxu0 %vm72_vm1, %v59_v38 }
  0x22   :  { %1725 = vmatpush1.bf16.msra.mxu1 %v2137_v46  ;;  %1741 = vmatpush1.bf16.msra.mxu0 %v2137_v46 }
  0x23   :  { %1727 = vmatprep.subr.bf16.mxu1 %v2141_v47  ;;  %1743 = vmatprep.subr.bf16.mxu0 %v2141_v47 }
  0x26   :  { %1729 = vmatpush1.bf16.msra.mxu1 %v2146_v52  ;;  %1745 = vmatpush1.bf16.msra.mxu0 %v2146_v52 }
  0x27   :  { %1747 = vmatprep.subr.bf16.mxu1 %v2120_v30  ;;  %1763 = vmatprep.subr.bf16.mxu0 %v2120_v30 }
  0xe9   :  { %v2103_v7 = vpop.f32.mrb[0].mxu0 }
  0xea   :  { %v167_v8 = vpop.f32.mrb[1].mxu0  ;;  %v173_v58 = vadd.f32 %v2103_v7, %v2101_v6 }
  0xeb   :  { %v168_v9 = vadd.f32 %v2101_v6, %v167_v8 }
  0xed   :  { %v250_v11 = vadd.f32 %v168_v9, %v168_v9 }
  0xef   :  { %v251_v12 = vsel %vm2106_vm5, %v250_v11, %v168_v9 }
  0xf0   :  { %v1615_v13 = vmul.f32 -1.442695, %v251_v12 }
  0xf2   :  { %1864 = vpow2.f32 %v1615_v13 }
  0xfc   :  { %v1865_v14 = vpop.eup %1864 }
  0xfd   :  { %v255_v15 = vadd.f32 1.0, %v1865_v14 }
  0xff   :  { %1866 = vrcp.f32 %v255_v15 }
 0x109   :  { %v1867_v16 = vpop.eup %1866 }
 0x10a   :  { %v258_v17 = vadd.f32 %v1867_v16, %v1867_v16 }
 0x10c   :  { %v1616_v18 = vadd.f32 -1.0, %v258_v17 }
 0x10e   :  { %v260_v19 = vsel %vm2106_vm5, %v1616_v18, %v1867_v16 }
 0x10f   :  { %267 = vrot.lane.b32.xlu0 %v260_v19, %s2012_s2 }
 0x113   :  { %262 = vrot.lane.b32.xlu0 %v242_v20, %s2013_s29 }
 0x181   :  { %v268_v21 = vpop.permute.xlu0 %267 }
 0x182   :  { %v270_v22 = vmul.f32 %v268_v21, %v260_v19  ;;  %v246_v21 = vld [vmem:[#allocation3 + $0x10] sm:$0xff] }
 0x184   :  { %272 = vrot.lane.b32.xlu1 %v270_v22, %s2013_s29 }
 0x185   :  { %v263_v23 = vpop.permute.xlu0 %262 }
 0x186   :  { %v265_v24 = vmul.f32 %v263_v23, %v260_v19 }
 0x1f6   :  { %v273_v25 = vpop.permute.xlu1 %272 }
 0x1f7   :  { %v2117_v26 = vadd.f32 %v273_v25, %v265_v24 }
 0x1f9   :  { %1868 = vtanh.f32 %v2117_v26 }
 0x203   :  { %v1869_v50 = vpop.eup %1868 }
 0x204   :  { %278 = vrot.lane.b32.xlu1 %v1869_v50, %s2012_s2 }
 0x208   :  { %287 = vrot.lane.b32.xlu1 %v244_v51, %s2013_s29 }
 0x276   :  { %v279_v53 = vpop.permute.xlu1 %278 }
 0x277   :  { %v281_v54 = vmul.f32 %v279_v53, %v260_v19  ;;  %v2225_v53 = vpop.f32.mrb[2].mxu0 }
 0x279   :  { %283 = vrot.lane.b32.xlu0 %v281_v54, %s2013_s29  ;;  %v177_v54 = vpop.f32.mrb[3].mxu0 }
 0x27a   :  { %v288_v55 = vpop.permute.xlu1 %287 }
 0x2eb   :  { %v284_v56 = vpop.permute.xlu0 %283 }
 0x2ec   :  { %v291_v57 = vsel %vm51_vm2, %v284_v56, %v288_v55 }
 0x2ed   :  { %1617 = vmatmul.mubr.msk.f32.vlgmr.msra.gmra.mrb[0].mxu1 %vm292_vm6, %v291_v57 }
 0x2ee   :  { %1749 = vmatpush1.bf16.msra.mxu1 %v2122_v34  ;;  %650 = vmatprep.mubr.f32.mxu1 %v2011_v3 }
 0x2ef   :  { %1751 = vmatprep.subr.bf16.mxu1 %v2124_v35 }
 0x2f2   :  { %1753 = vmatpush1.bf16.msra.mxu1 %v2129_v40 }
 0x2f3   :  { %1755 = vmatprep.subr.bf16.mxu1 %v2133_v41 }
 0x2f6   :  { %1757 = vmatpush1.bf16.msra.mxu1 %v2137_v46 }
 0x2f7   :  { %1759 = vmatprep.subr.bf16.mxu1 %v2141_v47 }
 0x2fa   :  { %1761 = vmatpush1.bf16.msra.mxu1 %v2146_v52 }
 0x2fb   :  { %1779 = vmatprep.subr.bf16.mxu1 %v2120_v30 }
 0x3c0   :  { %v362_v60 = vpop.f32.mrb[0].mxu1 }
 0x3c1   :  { %v402_v61 = vadd.f32 %v362_v60, %v173_v58  ;;  %v364_v62 = vpop.f32.mrb[1].mxu1 }
 0x3c2   :  { %v367_v63 = vadd.f32 %v2173_v59, %v364_v62 }
 0x3c3   :  { %v403_v0 = vadd.f32 %v402_v61, %v402_v61 }
 0x3c4   :  { %v368_v1 = vadd.f32 %v367_v63, %v367_v63 }
 0x3c5   :  { %v404_v2 = vsel %vm2106_vm5, %v403_v0, %v402_v61 }
 0x3c6   :  { %v1620_v4 = vmul.f32 -1.442695, %v404_v2  ;;  %v369_v5 = vsel %vm2106_vm5, %v368_v1, %v367_v63  ;;  %v178_v63 = vadd.f32 %v2101_v6, %v177_v54 }
 0x3c7   :  { %v1618_v7 = vmul.f32 -1.442695, %v369_v5 }
 0x3c8   :  { %1870 = vpow2.f32 %v1620_v4 }
 0x3c9   :  { %1872 = vpow2.f32 %v1618_v7 }
 0x3d2   :  { %v1871_v8 = vpop.eup %1870 }
 0x3d3   :  { %v1873_v9 = vpop.eup %1872  ;;  %v408_v11 = vadd.f32 1.0, %v1871_v8 }
 0x3d4   :  { %v373_v12 = vadd.f32 1.0, %v1873_v9 }
 0x3d5   :  { %1874 = vrcp.f32 %v408_v11 }
 0x3d6   :  { %1876 = vrcp.f32 %v373_v12 }
 0x3df   :  { %v1875_v13 = vpop.eup %1874 }
 0x3e0   :  { %v1877_v14 = vpop.eup %1876  ;;  %v411_v15 = vadd.f32 %v1875_v13, %v1875_v13 }
 0x3e1   :  { %v376_v16 = vadd.f32 %v1877_v14, %v1877_v14 }
 0x3e2   :  { %v1621_v17 = vadd.f32 -1.0, %v411_v15 }
 0x3e3   :  { %v1619_v18 = vadd.f32 -1.0, %v376_v16 }
 0x3e4   :  { %v413_v19 = vsel %vm2106_vm5, %v1621_v17, %v1875_v13 }
 0x3e5   :  { %416 = vrot.lane.b32.xlu1 %v413_v19, %s2012_s2  ;;  %v378_v20 = vsel %vm2106_vm5, %v1619_v18, %v1877_v14  ;;  %v414_v28 = vmul.f32 %v413_v19, %v2117_v26  ;;  %v60_v26 = vld [vmem:[%s2481_s0 + $0x20] sm:$0xff] }
 0x3e6   :  { %385 = vrot.lane.b32.xlu0 %v378_v20, %s2012_s2  ;;  %1686 = vmatprep.mubr.msk.f32.mxu0 %vm72_vm1, %v60_v26 }
 0x3e7   :  { %1687 = vmatmul.mubr.msk.f32.gmra.mrb[4].mxu0 %vm72_vm1, %v61_v39 }
 0x3e8   :  { %1689 = vmatprep.mubr.msk.f32.mxu0 %vm72_vm1, %v62_v42 }
 0x3ea   :  { %380 = vrot.lane.b32.xlu0 %v246_v21, %s2013_s29 }
 0x3eb   :  { %1690 = vmatmul.mubr.msk.f32.gmra.mrb[6].mxu0 %vm72_vm1, %v63_v43 }
 0x3ec   :  { %507 = vmatprep.mubr.f32.mxu0 %v2011_v3 }
 0x457   :  { %v417_v22 = vpop.permute.xlu1 %416 }
 0x458   :  { %v419_v23 = vmul.f32 %v417_v22, %v413_v19  ;;  %v386_v24 = vpop.permute.xlu0 %385 }
 0x459   :  { %v388_v25 = vmul.f32 %v386_v24, %v378_v20 }
 0x45a   :  { %421 = vrot.lane.b32.xlu0 %v419_v23, %s2013_s29 }
 0x45b   :  { %390 = vrot.lane.b32.xlu1 %v388_v25, %s2013_s29 }
 0x45c   :  { %v381_v27 = vpop.permute.xlu0 %380 }
 0x45d   :  { %v383_v29 = vmul.f32 %v381_v27, %v378_v20 }
 0x4ba   :  { %v2227_v55 = vpop.f32.mrb[4].mxu0 }
 0x4bb   :  { %v2229_v56 = vpop.f32.mrb[5].mxu0 }
 0x4be   :  { %v2231_v57 = vpop.f32.mrb[6].mxu0 }
 0x4bf   :  { %v2233_v58 = vpop.f32.mrb[7].mxu0 }
 0x4cc   :  { %v422_v31 = vpop.permute.xlu0 %421 }
 0x4cd   :  { %v2190_v32 = vadd.f32 %v422_v31, %v414_v28  ;;  %v391_v33 = vpop.permute.xlu1 %390 }
 0x4ce   :  { %v2192_v36 = vadd.f32 %v391_v33, %v383_v29 }
 0x4cf   :  { %1878 = vtanh.f32 %v2190_v32 }
 0x4d0   :  { %1880 = vtanh.f32 %v2192_v36 }
 0x4d9   :  { %v1879_v44 = vpop.eup %1878 }
 0x4da   :  { %v1881_v45 = vpop.eup %1880  ;;  %427 = vrot.lane.b32.xlu0 %v1879_v44, %s2012_s2 }
 0x4db   :  { %396 = vrot.lane.b32.xlu1 %v1881_v45, %s2012_s2 }
 0x54c   :  { %v428_v48 = vpop.permute.xlu0 %427 }
 0x54d   :  { %v430_v49 = vmul.f32 %v428_v48, %v413_v19  ;;  %v397_v50 = vpop.permute.xlu1 %396 }
 0x54e   :  { %v399_v51 = vmul.f32 %v397_v50, %v378_v20 }
 0x54f   :  { %432 = vrot.lane.b32.xlu1 %v430_v49, %s2013_s29 }
 0x550   :  { %436 = vrot.lane.b32.xlu0 %v399_v51, %s2012_s2  ;;  %v183_v51 = vadd.f32 %v2225_v53, %v2101_v6 }
 0x5c1   :  { %v433_v60 = vpop.permute.xlu1 %432 }
 0x5c2   :  { %v437_v61 = vpop.permute.xlu0 %436 }
 0x5c3   :  { %v439_v62 = vsel %vm51_vm2, %v433_v60, %v437_v61 }
 0x5c4   :  { %1622 = vmatmul.mubr.msk.f32.vlgmr.msra.gmra.mrb[8].mxu0 %vm292_vm6, %v439_v62 }
 0x5c5   :  { %1765 = vmatpush1.bf16.msra.mxu0 %v2122_v34  ;;  %793 = vmatprep.mubr.f32.mxu0 %v2011_v3 }
 0x5c6   :  { %1767 = vmatprep.subr.bf16.mxu0 %v2124_v35 }
 0x5c9   :  { %1769 = vmatpush1.bf16.msra.mxu0 %v2129_v40 }
 0x5ca   :  { %1771 = vmatprep.subr.bf16.mxu0 %v2133_v41 }
 0x5cd   :  { %1773 = vmatpush1.bf16.msra.mxu0 %v2137_v46 }
 0x5ce   :  { %1775 = vmatprep.subr.bf16.mxu0 %v2141_v47 }
 0x5d1   :  { %1777 = vmatpush1.bf16.msra.mxu0 %v2146_v52 }
 0x5d2   :  { %1795 = vmatprep.subr.bf16.mxu0 %v2120_v30 }
 0x697   :  { %v509_v0 = vpop.f32.mrb[8].mxu0 }
 0x698   :  { %v545_v1 = vadd.f32 %v509_v0, %v178_v63  ;;  %v511_v2 = vpop.f32.mrb[9].mxu0 }
 0x699   :  { %v514_v4 = vadd.f32 %v2173_v59, %v511_v2 }
 0x69a   :  { %v546_v5 = vadd.f32 %v545_v1, %v545_v1 }
 0x69b   :  { %v515_v7 = vadd.f32 %v514_v4, %v514_v4 }
 0x69c   :  { %v547_v8 = vsel %vm2106_vm5, %v546_v5, %v545_v1 }
 0x69d   :  { %v1625_v9 = vmul.f32 -1.442695, %v547_v8  ;;  %v516_v11 = vsel %vm2106_vm5, %v515_v7, %v514_v4 }
 0x69e   :  { %v1623_v12 = vmul.f32 -1.442695, %v516_v11 }
 0x69f   :  { %1882 = vpow2.f32 %v1625_v9 }
 0x6a0   :  { %1884 = vpow2.f32 %v1623_v12 }
 0x6a9   :  { %v1883_v13 = vpop.eup %1882 }
 0x6aa   :  { %v1885_v14 = vpop.eup %1884  ;;  %v551_v15 = vadd.f32 1.0, %v1883_v13 }
 0x6ab   :  { %v520_v16 = vadd.f32 1.0, %v1885_v14 }
 0x6ac   :  { %1886 = vrcp.f32 %v551_v15 }
 0x6ad   :  { %1888 = vrcp.f32 %v520_v16 }
 0x6b6   :  { %v1887_v17 = vpop.eup %1886 }
 0x6b7   :  { %v1889_v18 = vpop.eup %1888  ;;  %v554_v19 = vadd.f32 %v1887_v17, %v1887_v17 }
 0x6b8   :  { %v523_v20 = vadd.f32 %v1889_v18, %v1889_v18 }
 0x6b9   :  { %v1626_v21 = vadd.f32 -1.0, %v554_v19 }
 0x6ba   :  { %v1624_v22 = vadd.f32 -1.0, %v523_v20 }
 0x6bb   :  { %v556_v23 = vsel %vm2106_vm5, %v1626_v21, %v1887_v17 }
 0x6bc   :  { %559 = vrot.lane.b32.xlu0 %v556_v23, %s2012_s2  ;;  %v525_v24 = vsel %vm2106_vm5, %v1624_v22, %v1889_v18  ;;  %v557_v31 = vmul.f32 %v556_v23, %v2190_v32 }
 0x6bd   :  { %528 = vrot.lane.b32.xlu1 %v525_v24, %s2012_s2  ;;  %v526_v37 = vmul.f32 %v525_v24, %v2192_v36 }
 0x72e   :  { %v560_v25 = vpop.permute.xlu0 %559 }
 0x72f   :  { %v562_v27 = vmul.f32 %v560_v25, %v556_v23  ;;  %v529_v28 = vpop.permute.xlu1 %528 }
 0x730   :  { %v531_v29 = vmul.f32 %v529_v28, %v525_v24 }
 0x731   :  { %564 = vrot.lane.b32.xlu0 %v562_v27, %s2013_s29 }
 0x732   :  { %533 = vrot.lane.b32.xlu1 %v531_v29, %s2013_s29 }
 0x7a3   :  { %v565_v33 = vpop.permute.xlu0 %564 }
 0x7a4   :  { %v2262_v38 = vadd.f32 %v565_v33, %v557_v31  ;;  %v534_v26 = vpop.permute.xlu1 %533 }
 0x7a5   :  { %v2264_v39 = vadd.f32 %v534_v26, %v526_v37 }
 0x7a6   :  { %1890 = vtanh.f32 %v2262_v38 }
 0x7a7   :  { %1892 = vtanh.f32 %v2264_v39 }
 0x7b0   :  { %v1891_v42 = vpop.eup %1890 }
 0x7b1   :  { %v1893_v43 = vpop.eup %1892  ;;  %570 = vrot.lane.b32.xlu0 %v1891_v42, %s2012_s2 }
 0x7b2   :  { %539 = vrot.lane.b32.xlu1 %v1893_v43, %s2012_s2 }
 0x823   :  { %v571_v44 = vpop.permute.xlu0 %570 }
 0x824   :  { %v573_v32 = vmul.f32 %v571_v44, %v556_v23  ;;  %v540_v45 = vpop.permute.xlu1 %539 }
 0x825   :  { %v542_v48 = vmul.f32 %v540_v45, %v525_v24 }
 0x826   :  { %575 = vrot.lane.b32.xlu1 %v573_v32, %s2013_s29  ;;  %v188_v32 = vadd.f32 %v2101_v6, %v2229_v56 }
 0x827   :  { %579 = vrot.lane.b32.xlu0 %v542_v48, %s2012_s2 }
 0x898   :  { %v576_v36 = vpop.permute.xlu1 %575 }
 0x899   :  { %v580_v49 = vpop.permute.xlu0 %579 }
 0x89a   :  { %v582_v50 = vsel %vm51_vm2, %v576_v36, %v580_v49 }
 0x89b   :  { %1627 = vmatmul.mubr.msk.f32.vlgmr.msra.gmra.mrb[2].mxu1 %vm292_vm6, %v582_v50 }
 0x89c   :  { %1781 = vmatpush1.bf16.msra.mxu1 %v2122_v34  ;;  %936 = vmatprep.mubr.f32.mxu1 %v2011_v3 }
 0x89d   :  { %1783 = vmatprep.subr.bf16.mxu1 %v2124_v35 }
 0x8a0   :  { %1785 = vmatpush1.bf16.msra.mxu1 %v2129_v40 }
 0x8a1   :  { %1787 = vmatprep.subr.bf16.mxu1 %v2133_v41 }
 0x8a4   :  { %1789 = vmatpush1.bf16.msra.mxu1 %v2137_v46 }
 0x8a5   :  { %1791 = vmatprep.subr.bf16.mxu1 %v2141_v47 }
 0x8a8   :  { %1793 = vmatpush1.bf16.msra.mxu1 %v2146_v52 }
 0x8a9   :  { %1811 = vmatprep.subr.bf16.mxu1 %v2120_v30 }
 0x96e   :  { %v652_v54 = vpop.f32.mrb[2].mxu1 }
 0x96f   :  { %v688_v60 = vadd.f32 %v652_v54, %v183_v51  ;;  %v654_v61 = vpop.f32.mrb[3].mxu1 }
 0x970   :  { %v657_v62 = vadd.f32 %v2173_v59, %v654_v61 }
 0x971   :  { %v689_v63 = vadd.f32 %v688_v60, %v688_v60 }
 0x972   :  { %v658_v0 = vadd.f32 %v657_v62, %v657_v62 }
 0x973   :  { %v690_v1 = vsel %vm2106_vm5, %v689_v63, %v688_v60 }
 0x974   :  { %v1630_v2 = vmul.f32 -1.442695, %v690_v1  ;;  %v659_v4 = vsel %vm2106_vm5, %v658_v0, %v657_v62 }
 0x975   :  { %v1628_v5 = vmul.f32 -1.442695, %v659_v4 }
 0x976   :  { %1894 = vpow2.f32 %v1630_v2 }
 0x977   :  { %1896 = vpow2.f32 %v1628_v5 }
 0x980   :  { %v1895_v7 = vpop.eup %1894 }
 0x981   :  { %v1897_v8 = vpop.eup %1896  ;;  %v694_v53 = vadd.f32 1.0, %v1895_v7 }
 0x982   :  { %v663_v9 = vadd.f32 1.0, %v1897_v8 }
 0x983   :  { %1898 = vrcp.f32 %v694_v53 }
 0x984   :  { %1900 = vrcp.f32 %v663_v9 }
 0x98d   :  { %v1899_v11 = vpop.eup %1898 }
 0x98e   :  { %v1901_v12 = vpop.eup %1900  ;;  %v697_v13 = vadd.f32 %v1899_v11, %v1899_v11 }
 0x98f   :  { %v666_v14 = vadd.f32 %v1901_v12, %v1901_v12 }
 0x990   :  { %v1631_v15 = vadd.f32 -1.0, %v697_v13 }
 0x991   :  { %v1629_v16 = vadd.f32 -1.0, %v666_v14 }
 0x992   :  { %v699_v17 = vsel %vm2106_vm5, %v1631_v15, %v1899_v11 }
 0x993   :  { %702 = vrot.lane.b32.xlu0 %v699_v17, %s2012_s2  ;;  %v668_v18 = vsel %vm2106_vm5, %v1629_v16, %v1901_v12  ;;  %v700_v23 = vmul.f32 %v699_v17, %v2262_v38 }
 0x994   :  { %671 = vrot.lane.b32.xlu1 %v668_v18, %s2012_s2  ;;  %v669_v25 = vmul.f32 %v668_v18, %v2264_v39 }
 0xa05   :  { %v703_v19 = vpop.permute.xlu0 %702 }
 0xa06   :  { %v705_v20 = vmul.f32 %v703_v19, %v699_v17  ;;  %v672_v21 = vpop.permute.xlu1 %671 }
 0xa07   :  { %v674_v22 = vmul.f32 %v672_v21, %v668_v18 }
 0xa08   :  { %707 = vrot.lane.b32.xlu0 %v705_v20, %s2013_s29 }
 0xa09   :  { %676 = vrot.lane.b32.xlu1 %v674_v22, %s2013_s29 }
 0xa7a   :  { %v708_v24 = vpop.permute.xlu0 %707 }
 0xa7b   :  { %v2300_v27 = vadd.f32 %v708_v24, %v700_v23  ;;  %v677_v28 = vpop.permute.xlu1 %676 }
 0xa7c   :  { %v2302_v29 = vadd.f32 %v677_v28, %v669_v25 }
 0xa7d   :  { %1902 = vtanh.f32 %v2300_v27 }
 0xa7e   :  { %1904 = vtanh.f32 %v2302_v29 }
 0xa87   :  { %v1903_v31 = vpop.eup %1902 }
 0xa88   :  { %v1905_v33 = vpop.eup %1904  ;;  %713 = vrot.lane.b32.xlu0 %v1903_v31, %s2012_s2 }
 0xa89   :  { %682 = vrot.lane.b32.xlu1 %v1905_v33, %s2012_s2  ;;  %v193_v33 = vadd.f32 %v2227_v55, %v2101_v6 }
 0xafa   :  { %v714_v37 = vpop.permute.xlu0 %713 }
 0xafb   :  { %v716_v38 = vmul.f32 %v714_v37, %v699_v17  ;;  %v683_v26 = vpop.permute.xlu1 %682 }
 0xafc   :  { %v685_v42 = vmul.f32 %v683_v26, %v668_v18 }
 0xafd   :  { %718 = vrot.lane.b32.xlu1 %v716_v38, %s2013_s29 }
 0xafe   :  { %722 = vrot.lane.b32.xlu0 %v685_v42, %s2012_s2 }
 0xb6f   :  { %v719_v39 = vpop.permute.xlu1 %718 }
 0xb70   :  { %v723_v43 = vpop.permute.xlu0 %722 }
 0xb71   :  { %v725_v44 = vsel %vm51_vm2, %v719_v39, %v723_v43 }
 0xb72   :  { %1632 = vmatmul.mubr.msk.f32.vlgmr.msra.gmra.mrb[10].mxu0 %vm292_vm6, %v725_v44 }
 0xb73   :  { %1797 = vmatpush1.bf16.msra.mxu0 %v2122_v34  ;;  %1079 = vmatprep.mubr.f32.mxu0 %v2011_v3 }
 0xb74   :  { %1799 = vmatprep.subr.bf16.mxu0 %v2124_v35 }
 0xb77   :  { %1801 = vmatpush1.bf16.msra.mxu0 %v2129_v40 }
 0xb78   :  { %1803 = vmatprep.subr.bf16.mxu0 %v2133_v41 }
 0xb7b   :  { %1805 = vmatpush1.bf16.msra.mxu0 %v2137_v46 }
 0xb7c   :  { %1807 = vmatprep.subr.bf16.mxu0 %v2141_v47 }
 0xb7f   :  { %1809 = vmatpush1.bf16.msra.mxu0 %v2146_v52 }
 0xb80   :  { %1827 = vmatprep.subr.bf16.mxu0 %v2120_v30 }
 0xc45   :  { %v795_v45 = vpop.f32.mrb[10].mxu0 }
 0xc46   :  { %v831_v48 = vadd.f32 %v795_v45, %v188_v32  ;;  %v797_v36 = vpop.f32.mrb[11].mxu0 }
 0xc47   :  { %v800_v49 = vadd.f32 %v2173_v59, %v797_v36 }
 0xc48   :  { %v832_v50 = vadd.f32 %v831_v48, %v831_v48 }
 0xc49   :  { %v801_v51 = vadd.f32 %v800_v49, %v800_v49 }
 0xc4a   :  { %v833_v54 = vsel %vm2106_vm5, %v832_v50, %v831_v48 }
 0xc4b   :  { %v1635_v60 = vmul.f32 -1.442695, %v833_v54  ;;  %v802_v61 = vsel %vm2106_vm5, %v801_v51, %v800_v49 }
 0xc4c   :  { %v1633_v62 = vmul.f32 -1.442695, %v802_v61 }
 0xc4d   :  { %1906 = vpow2.f32 %v1635_v60 }
 0xc4e   :  { %1908 = vpow2.f32 %v1633_v62 }
 0xc57   :  { %v1907_v30 = vpop.eup %1906 }
 0xc58   :  { %v1909_v63 = vpop.eup %1908  ;;  %v837_v56 = vadd.f32 1.0, %v1907_v30 }
 0xc59   :  { %v806_v0 = vadd.f32 1.0, %v1909_v63 }
 0xc5a   :  { %1910 = vrcp.f32 %v837_v56 }
 0xc5b   :  { %1912 = vrcp.f32 %v806_v0 }
 0xc64   :  { %v1911_v1 = vpop.eup %1910 }
 0xc65   :  { %v1913_v2 = vpop.eup %1912  ;;  %v840_v4 = vadd.f32 %v1911_v1, %v1911_v1 }
 0xc66   :  { %v809_v5 = vadd.f32 %v1913_v2, %v1913_v2 }
 0xc67   :  { %v1636_v7 = vadd.f32 -1.0, %v840_v4 }
 0xc68   :  { %v1634_v8 = vadd.f32 -1.0, %v809_v5 }
 0xc69   :  { %v842_v53 = vsel %vm2106_vm5, %v1636_v7, %v1911_v1 }
 0xc6a   :  { %845 = vrot.lane.b32.xlu0 %v842_v53, %s2012_s2  ;;  %v811_v9 = vsel %vm2106_vm5, %v1634_v8, %v1913_v2  ;;  %v843_v15 = vmul.f32 %v842_v53, %v2300_v27 }
 0xc6b   :  { %814 = vrot.lane.b32.xlu1 %v811_v9, %s2012_s2  ;;  %v812_v17 = vmul.f32 %v811_v9, %v2302_v29 }
 0xcdc   :  { %v846_v11 = vpop.permute.xlu0 %845 }
 0xcdd   :  { %v848_v12 = vmul.f32 %v846_v11, %v842_v53  ;;  %v815_v13 = vpop.permute.xlu1 %814 }
 0xcde   :  { %v817_v14 = vmul.f32 %v815_v13, %v811_v9 }
 0xcdf   :  { %850 = vrot.lane.b32.xlu0 %v848_v12, %s2013_s29 }
 0xce0   :  { %819 = vrot.lane.b32.xlu1 %v817_v14, %s2013_s29 }
 0xd51   :  { %v851_v16 = vpop.permute.xlu0 %850 }
 0xd52   :  { %v853_v18 = vadd.f32 %v851_v16, %v843_v15  ;;  %v820_v19 = vpop.permute.xlu1 %819 }
 0xd53   :  { %v822_v20 = vadd.f32 %v820_v19, %v812_v17 }
 0xd54   :  { %1914 = vtanh.f32 %v853_v18 }
 0xd55   :  { %1916 = vtanh.f32 %v822_v20 }
 0xd5e   :  { %v1915_v21 = vpop.eup %1914 }
 0xd5f   :  { %v1917_v22 = vpop.eup %1916  ;;  %856 = vrot.lane.b32.xlu0 %v1915_v21, %s2012_s2  ;;  %v198_v21 = vadd.f32 %v2101_v6, %v2233_v58 }
 0xd60   :  { %825 = vrot.lane.b32.xlu1 %v1917_v22, %s2012_s2 }
 0xdd1   :  { %v857_v23 = vpop.permute.xlu0 %856 }
 0xdd2   :  { %v859_v24 = vmul.f32 %v857_v23, %v842_v53  ;;  %v826_v25 = vpop.permute.xlu1 %825 }
 0xdd3   :  { %v828_v28 = vmul.f32 %v826_v25, %v811_v9 }
 0xdd4   :  { %861 = vrot.lane.b32.xlu1 %v859_v24, %s2013_s29 }
 0xdd5   :  { %865 = vrot.lane.b32.xlu0 %v828_v28, %s2012_s2 }
 0xe46   :  { %v862_v27 = vpop.permute.xlu1 %861 }
 0xe47   :  { %v866_v29 = vpop.permute.xlu0 %865 }
 0xe48   :  { %v868_v31 = vsel %vm51_vm2, %v862_v27, %v866_v29 }
 0xe49   :  { %1637 = vmatmul.mubr.msk.f32.vlgmr.msra.gmra.mrb[4].mxu1 %vm292_vm6, %v868_v31 }
 0xe4a   :  { %1813 = vmatpush1.bf16.msra.mxu1 %v2122_v34  ;;  %1222 = vmatprep.mubr.f32.mxu1 %v2011_v3 }
 0xe4b   :  { %1815 = vmatprep.subr.bf16.mxu1 %v2124_v35 }
 0xe4e   :  { %1817 = vmatpush1.bf16.msra.mxu1 %v2129_v40 }
 0xe4f   :  { %1819 = vmatprep.subr.bf16.mxu1 %v2133_v41 }
 0xe52   :  { %1821 = vmatpush1.bf16.msra.mxu1 %v2137_v46 }
 0xe53   :  { %1823 = vmatprep.subr.bf16.mxu1 %v2141_v47 }
 0xe56   :  { %1825 = vmatpush1.bf16.msra.mxu1 %v2146_v52 }
 0xf1c   :  { %v938_v37 = vpop.f32.mrb[4].mxu1 }
 0xf1d   :  { %v974_v38 = vadd.f32 %v938_v37, %v193_v33  ;;  %v940_v26 = vpop.f32.mrb[5].mxu1 }
 0xf1e   :  { %v943_v42 = vadd.f32 %v2173_v59, %v940_v26 }
 0xf1f   :  { %v975_v39 = vadd.f32 %v974_v38, %v974_v38 }
 0xf20   :  { %v944_v43 = vadd.f32 %v943_v42, %v943_v42 }
 0xf21   :  { %v976_v44 = vsel %vm2106_vm5, %v975_v39, %v974_v38 }
 0xf22   :  { %v1640_v32 = vmul.f32 -1.442695, %v976_v44  ;;  %v945_v45 = vsel %vm2106_vm5, %v944_v43, %v943_v42 }
 0xf23   :  { %v1638_v48 = vmul.f32 -1.442695, %v945_v45 }
 0xf24   :  { %1918 = vpow2.f32 %v1640_v32 }
 0xf25   :  { %1920 = vpow2.f32 %v1638_v48 }
 0xf2e   :  { %v1919_v36 = vpop.eup %1918 }
 0xf2f   :  { %v1921_v49 = vpop.eup %1920  ;;  %v980_v55 = vadd.f32 1.0, %v1919_v36 }
 0xf30   :  { %v949_v50 = vadd.f32 1.0, %v1921_v49 }
 0xf31   :  { %1922 = vrcp.f32 %v980_v55 }
 0xf32   :  { %1924 = vrcp.f32 %v949_v50 }
 0xf3b   :  { %v1923_v51 = vpop.eup %1922 }
 0xf3c   :  { %v1925_v54 = vpop.eup %1924  ;;  %v983_v60 = vadd.f32 %v1923_v51, %v1923_v51 }
 0xf3d   :  { %v952_v61 = vadd.f32 %v1925_v54, %v1925_v54 }
 0xf3e   :  { %v1641_v62 = vadd.f32 -1.0, %v983_v60 }
 0xf3f   :  { %v1639_v30 = vadd.f32 -1.0, %v952_v61 }
 0xf40   :  { %v985_v63 = vsel %vm2106_vm5, %v1641_v62, %v1923_v51 }
 0xf41   :  { %988 = vrot.lane.b32.xlu0 %v985_v63, %s2012_s2  ;;  %v954_v56 = vsel %vm2106_vm5, %v1639_v30, %v1925_v54  ;;  %v986_v5 = vmul.f32 %v985_v63, %v853_v18 }
 0xf42   :  { %957 = vrot.lane.b32.xlu1 %v954_v56, %s2012_s2  ;;  %v955_v8 = vmul.f32 %v954_v56, %v822_v20 }
 0xfb3   :  { %v989_v0 = vpop.permute.xlu0 %988 }
 0xfb4   :  { %v991_v1 = vmul.f32 %v989_v0, %v985_v63  ;;  %v958_v2 = vpop.permute.xlu1 %957 }
 0xfb5   :  { %v960_v4 = vmul.f32 %v958_v2, %v954_v56  ;;  %v203_v2 = vadd.f32 %v2231_v57, %v2101_v6 }
 0xfb6   :  { %993 = vrot.lane.b32.xlu0 %v991_v1, %s2013_s29 }
 0xfb7   :  { %962 = vrot.lane.b32.xlu1 %v960_v4, %s2013_s29 }
0x1028   :  { %v994_v7 = vpop.permute.xlu0 %993 }
0x1029   :  { %v996_v53 = vadd.f32 %v994_v7, %v986_v5  ;;  %v963_v9 = vpop.permute.xlu1 %962 }
0x102a   :  { %v965_v11 = vadd.f32 %v963_v9, %v955_v8 }
0x102b   :  { %1926 = vtanh.f32 %v996_v53 }
0x102c   :  { %1928 = vtanh.f32 %v965_v11 }
0x1035   :  { %v1927_v12 = vpop.eup %1926 }
0x1036   :  { %v1929_v13 = vpop.eup %1928  ;;  %999 = vrot.lane.b32.xlu0 %v1927_v12, %s2012_s2 }
0x1037   :  { %968 = vrot.lane.b32.xlu1 %v1929_v13, %s2012_s2 }
0x10a8   :  { %v1000_v14 = vpop.permute.xlu0 %999 }
0x10a9   :  { %v1002_v15 = vmul.f32 %v1000_v14, %v985_v63  ;;  %v969_v16 = vpop.permute.xlu1 %968 }
0x10aa   :  { %v971_v17 = vmul.f32 %v969_v16, %v954_v56 }
0x10ab   :  { %1004 = vrot.lane.b32.xlu1 %v1002_v15, %s2013_s29 }
0x10ac   :  { %1008 = vrot.lane.b32.xlu0 %v971_v17, %s2012_s2 }
0x111d   :  { %v1005_v18 = vpop.permute.xlu1 %1004 }
0x111e   :  { %v1009_v19 = vpop.permute.xlu0 %1008 }
0x111f   :  { %v1011_v20 = vsel %vm51_vm2, %v1005_v18, %v1009_v19 }
0x1120   :  { %1642 = vmatmul.mubr.msk.f32.vlgmr.msra.gmra.mrb[12].mxu0 %vm292_vm6, %v1011_v20 }
0x1121   :  { %1829 = vmatpush1.bf16.msra.mxu0 %v2122_v34  ;;  %1365 = vmatprep.mubr.f32.mxu0 %v2011_v3 }
0x1122   :  { %1831 = vmatprep.subr.bf16.mxu0 %v2124_v35 }
0x1125   :  { %1833 = vmatpush1.bf16.msra.mxu0 %v2129_v40 }
0x1126   :  { %1835 = vmatprep.subr.bf16.mxu0 %v2133_v41 }
0x1129   :  { %1837 = vmatpush1.bf16.msra.mxu0 %v2137_v46 }
0x112a   :  { %1839 = vmatprep.subr.bf16.mxu0 %v2141_v47 }
0x112d   :  { %1841 = vmatpush1.bf16.msra.mxu0 %v2146_v52 }
0x11f3   :  { %v1081_v22 = vpop.f32.mrb[12].mxu0 }
0x11f4   :  { %v1117_v23 = vadd.f32 %v1081_v22, %v198_v21  ;;  %v1083_v34 = vpop.f32.mrb[13].mxu0 }
0x11f5   :  { %v1086_v24 = vadd.f32 %v2173_v59, %v1083_v34 }
0x11f6   :  { %v1118_v25 = vadd.f32 %v1117_v23, %v1117_v23 }
0x11f7   :  { %v1087_v35 = vadd.f32 %v1086_v24, %v1086_v24 }
0x11f8   :  { %v1119_v40 = vsel %vm2106_vm5, %v1118_v25, %v1117_v23 }
0x11f9   :  { %v1645_v41 = vmul.f32 -1.442695, %v1119_v40  ;;  %v1088_v46 = vsel %vm2106_vm5, %v1087_v35, %v1086_v24 }
0x11fa   :  { %v1643_v47 = vmul.f32 -1.442695, %v1088_v46 }
0x11fb   :  { %1930 = vpow2.f32 %v1645_v41 }
0x11fc   :  { %1932 = vpow2.f32 %v1643_v47 }
0x1205   :  { %v1931_v52 = vpop.eup %1930 }
0x1206   :  { %v1933_v28 = vpop.eup %1932  ;;  %v1123_v58 = vadd.f32 1.0, %v1931_v52 }
0x1207   :  { %v1092_v27 = vadd.f32 1.0, %v1933_v28 }
0x1208   :  { %1934 = vrcp.f32 %v1123_v58 }
0x1209   :  { %1936 = vrcp.f32 %v1092_v27 }
0x1212   :  { %v1935_v29 = vpop.eup %1934 }
0x1213   :  { %v1937_v31 = vpop.eup %1936  ;;  %v1126_v33 = vadd.f32 %v1935_v29, %v1935_v29 }
0x1214   :  { %v1095_v37 = vadd.f32 %v1937_v31, %v1937_v31 }
0x1215   :  { %v1646_v38 = vadd.f32 -1.0, %v1126_v33 }
0x1216   :  { %v1644_v26 = vadd.f32 -1.0, %v1095_v37 }
0x1217   :  { %v1128_v42 = vsel %vm2106_vm5, %v1646_v38, %v1935_v29 }
0x1218   :  { %1131 = vrot.lane.b32.xlu0 %v1128_v42, %s2012_s2  ;;  %v1097_v39 = vsel %vm2106_vm5, %v1644_v26, %v1937_v31  ;;  %v1129_v48 = vmul.f32 %v1128_v42, %v996_v53 }
0x1219   :  { %1100 = vrot.lane.b32.xlu1 %v1097_v39, %s2012_s2  ;;  %v1098_v49 = vmul.f32 %v1097_v39, %v965_v11 }
0x128a   :  { %v1132_v43 = vpop.permute.xlu0 %1131 }
0x128b   :  { %v1134_v44 = vmul.f32 %v1132_v43, %v1128_v42  ;;  %v1101_v32 = vpop.permute.xlu1 %1100 }
0x128c   :  { %v1103_v45 = vmul.f32 %v1101_v32, %v1097_v39 }
0x128d   :  { %1136 = vrot.lane.b32.xlu0 %v1134_v44, %s2013_s29 }
0x128e   :  { %1105 = vrot.lane.b32.xlu1 %v1103_v45, %s2013_s29 }
0x12ff   :  { %v1137_v36 = vpop.permute.xlu0 %1136 }
0x1300   :  { %v1139_v55 = vadd.f32 %v1137_v36, %v1129_v48  ;;  %v1106_v50 = vpop.permute.xlu1 %1105 }
0x1301   :  { %v1108_v51 = vadd.f32 %v1106_v50, %v1098_v49 }
0x1302   :  { %1938 = vtanh.f32 %v1139_v55 }
0x1303   :  { %1940 = vtanh.f32 %v1108_v51 }
0x130c   :  { %v1939_v54 = vpop.eup %1938 }
0x130d   :  { %v1941_v60 = vpop.eup %1940  ;;  %1142 = vrot.lane.b32.xlu0 %v1939_v54, %s2012_s2 }
0x130e   :  { %1111 = vrot.lane.b32.xlu1 %v1941_v60, %s2012_s2 }
0x137f   :  { %v1143_v61 = vpop.permute.xlu0 %1142 }
0x1380   :  { %v1145_v62 = vmul.f32 %v1143_v61, %v1128_v42  ;;  %v1112_v30 = vpop.permute.xlu1 %1111 }
0x1381   :  { %v1114_v63 = vmul.f32 %v1112_v30, %v1097_v39 }
0x1382   :  { %1147 = vrot.lane.b32.xlu1 %v1145_v62, %s2013_s29 }
0x1383   :  { %1151 = vrot.lane.b32.xlu0 %v1114_v63, %s2012_s2 }
0x13f4   :  { %v1148_v56 = vpop.permute.xlu1 %1147 }
0x13f5   :  { %v1152_v0 = vpop.permute.xlu0 %1151 }
0x13f6   :  { %v1154_v1 = vsel %vm51_vm2, %v1148_v56, %v1152_v0  ;;  %v1420_v56 = vld [vmem:[%s2486_s5] sm:$0xff]  ;;  %v1421_v0 = vld [vmem:[%s2486_s5 + $0x8] sm:$0xff] }
0x13f7   :  { %1647 = vmatmul.mubr.msk.f32.vlgmr.msra.gmra.mrb[6].mxu1 %vm292_vm6, %v1154_v1  ;;  %v2014_v1 = vmov 0.0|0.0  }
0x13f8   :  { %1842 = vmatprep.subr.bf16.mxu1 %v2014_v1  ;;  %1700 = vmatprep.mubr.msk.f32.mxu1 %vm2015_vm7, %v2011_v3 }
0x13f9   :  { %1848 = vmatprep.subr.bf16.mxu0 %v2014_v1 }
0x14ca   :  { %v1224_v4 = vpop.f32.mrb[6].mxu1 }
0x14cb   :  { %v1260_v5 = vadd.f32 %v1224_v4, %v203_v2  ;;  %v1226_v7 = vpop.f32.mrb[7].mxu1  ;;  %v1843_v2 = vpack.c.bf16 %v1421_v0, %v1420_v56  ;;  %v1423_v4 = vld [vmem:[%s2486_s5 + $0x18] sm:$0xff] }
0x14cc   :  { %v1229_v8 = vadd.f32 %v2173_v59, %v1226_v7 }
0x14cd   :  { %v1261_v53 = vadd.f32 %v1260_v5, %v1260_v5  ;;  %1844 = vmatpush3.bf16.msra.mxu1 %v1843_v2 }
0x14ce   :  { %v1230_v9 = vadd.f32 %v1229_v8, %v1229_v8  ;;  %1845 = vmatprep.subr.bf16.mxu1 %v2014_v1 }
0x14cf   :  { %v1262_v11 = vsel %vm2106_vm5, %v1261_v53, %v1260_v5  ;;  %v1846_v5 = vpack.c.bf16 %v1423_v4, %v1422_v10  ;;  %v1505_v53 = vld [vmem:[%s2488_s7 + $0x8] sm:$0xff] }
0x14d0   :  { %v1650_v12 = vmul.f32 -1.442695, %v1262_v11  ;;  %v1231_v13 = vsel %vm2106_vm5, %v1230_v9, %v1229_v8  ;;  %v1504_v8 = vld [vmem:[%s2488_s7] sm:$0xff] }
0x14d1   :  { %v1648_v14 = vmul.f32 -1.442695, %v1231_v13  ;;  %1847 = vmatpush3.bf16.msra.mxu1 %v1846_v5  ;;  %v1849_v9 = vpack.c.bf16 %v1505_v53, %v1504_v8 }
0x14d2   :  { %1942 = vpow2.f32 %v1650_v12 }
0x14d3   :  { %1944 = vpow2.f32 %v1648_v14 }
0x14dc   :  { %v1943_v15 = vpop.eup %1942 }
0x14dd   :  { %v1945_v16 = vpop.eup %1944  ;;  %v1266_v6 = vadd.f32 1.0, %v1943_v15  ;;  %v1506_v15 = vld [vmem:[%s2488_s7 + $0x10] sm:$0xff] }
0x14de   :  { %v1235_v57 = vadd.f32 1.0, %v1945_v16  ;;  %v1507_v16 = vld [vmem:[%s2488_s7 + $0x18] sm:$0xff]  ;;  %s1982_s7 = scalar_lea.vmem %s1596_s17, 128 }
0x14df   :  { %1946 = vrcp.f32 %v1266_v6  ;;  %v1852_v6 = vpack.c.bf16 %v1507_v16, %v1506_v15  ;;  %p1983_p8 = scmp.ne.s32.totalorder %s1596_s17, %s1982_s7  ;;  %p1988_p10 = scmp.lt.s32.totalorder %s1982_s7, %s1982_s7 }
0x14e0   :  { %1948 = vrcp.f32 %v1235_v57  ;;  %v1655_v57 = vld [vmem:[%s2487_s6] ss:$0 sm:$0xff] }
0x14e1   :  { %p1989_p11 = por %p1988_p10, %p1987_p9 }
0x14e3   :  { %p1990_p12 = pnand %p1989_p11, %p1983_p8 }
0x14e9   :  { %v1947_v17 = vpop.eup %1946 }
0x14ea   :  { %v1949_v18 = vpop.eup %1948  ;;  %v1269_v19 = vadd.f32 %v1947_v17, %v1947_v17 }
0x14eb   :  { %v1238_v20 = vadd.f32 %v1949_v18, %v1949_v18 }
0x14ec   :  { %v1651_v21 = vadd.f32 -1.0, %v1269_v19 }
0x14ed   :  { %v1649_v22 = vadd.f32 -1.0, %v1238_v20 }
0x14ee   :  { %v1271_v23 = vsel %vm2106_vm5, %v1651_v21, %v1947_v17  ;;  %v1657_v21 = vld [vmem:[%s2489_s8] ss:$0 sm:$0xff] }
0x14ef   :  { %1274 = vrot.lane.b32.xlu0 %v1271_v23, %s2012_s2  ;;  %v1240_v34 = vsel %vm2106_vm5, %v1649_v22, %v1949_v18  ;;  %v1272_v41 = vmul.f32 %v1271_v23, %v1139_v55 }
0x14f0   :  { %1243 = vrot.lane.b32.xlu1 %v1240_v34, %s2012_s2  ;;  %v1241_v47 = vmul.f32 %v1240_v34, %v1108_v51 }
0x1561   :  { %v1275_v24 = vpop.permute.xlu0 %1274 }
0x1562   :  { %v1277_v25 = vmul.f32 %v1275_v24, %v1271_v23  ;;  %v1244_v35 = vpop.permute.xlu1 %1243 }
0x1563   :  { %v1246_v40 = vmul.f32 %v1244_v35, %v1240_v34 }
0x1564   :  { %1279 = vrot.lane.b32.xlu0 %v1277_v25, %s2013_s29 }
0x1565   :  { %1248 = vrot.lane.b32.xlu1 %v1246_v40, %s2013_s29 }
0x15d6   :  { %v1280_v46 = vpop.permute.xlu0 %1279 }
0x15d7   :  { %v1282_v52 = vadd.f32 %v1280_v46, %v1272_v41  ;;  %v1249_v28 = vpop.permute.xlu1 %1248 }
0x15d8   :  { %v1251_v58 = vadd.f32 %v1249_v28, %v1241_v47 }
0x15d9   :  { %1950 = vtanh.f32 %v1282_v52 }
0x15da   :  { %1952 = vtanh.f32 %v1251_v58 }
0x15e3   :  { %v1951_v27 = vpop.eup %1950 }
0x15e4   :  { %v1953_v29 = vpop.eup %1952  ;;  %1285 = vrot.lane.b32.xlu0 %v1951_v27, %s2012_s2 }
0x15e5   :  { %1254 = vrot.lane.b32.xlu1 %v1953_v29, %s2012_s2 }
0x1656   :  { %v1286_v31 = vpop.permute.xlu0 %1285 }
0x1657   :  { %v1288_v33 = vmul.f32 %v1286_v31, %v1271_v23  ;;  %v1255_v37 = vpop.permute.xlu1 %1254 }
0x1658   :  { %v1257_v38 = vmul.f32 %v1255_v37, %v1240_v34 }
0x1659   :  { %1290 = vrot.lane.b32.xlu1 %v1288_v33, %s2013_s29 }
0x165a   :  { %1294 = vrot.lane.b32.xlu0 %v1257_v38, %s2012_s2 }
0x16cb   :  { %v1291_v26 = vpop.permute.xlu1 %1290 }
0x16cc   :  { %v1295_v42 = vpop.permute.xlu0 %1294 }
0x16cd   :  { %v1297_v39 = vsel %vm51_vm2, %v1291_v26, %v1295_v42 }
0x16ce   :  { %1652 = vmatmul.mubr.msk.f32.vlgmr.msra.gmra.mrb[14].mxu0 %vm292_vm6, %v1297_v39 }
0x16cf   :  { %1711 = vmatprep.mubr.msk.f32.mxu0 %vm2015_vm7, %v2011_v3  ;;  %1850 = vmatpush3.bf16.msra.mxu0 %v1849_v9 }
0x16d0   :  { %1851 = vmatprep.subr.bf16.mxu0 %v2014_v1 }
0x16d3   :  { %1853 = vmatpush3.bf16.msra.mxu0 %v1852_v6 }
0x17a1   :  { %v1367_v43 = vpop.f32.mrb[14].mxu0 }
0x17a2   :  { %v1369_v44 = vpop.f32.mrb[15].mxu0 }
0x17a3   :  { %v1372_v32 = vadd.f32 %v2173_v59, %v1369_v44 }
0x17a5   :  { %v1373_v45 = vadd.f32 %v1372_v32, %v1372_v32 }
0x17a7   :  { %v1374_v48 = vsel %vm2106_vm5, %v1373_v45, %v1372_v32 }
0x17a8   :  { %v1653_v36 = vmul.f32 -1.442695, %v1374_v48 }
0x17aa   :  { %1954 = vpow2.f32 %v1653_v36 }
0x17b4   :  { %v1955_v49 = vpop.eup %1954 }
0x17b5   :  { %v1378_v55 = vadd.f32 1.0, %v1955_v49 }
0x17b7   :  { %1956 = vrcp.f32 %v1378_v55 }
0x17c1   :  { %v1957_v50 = vpop.eup %1956 }
0x17c2   :  { %v1381_v51 = vadd.f32 %v1957_v50, %v1957_v50 }
0x17c4   :  { %v1654_v54 = vadd.f32 -1.0, %v1381_v51 }
0x17c6   :  { %v1383_v60 = vsel %vm2106_vm5, %v1654_v54, %v1957_v50 }
0x17c7   :  { %1386 = vrot.lane.b32.xlu1 %v1383_v60, %s2012_s2  ;;  %v1384_v59 = vmul.f32 %v1383_v60, %v1251_v58 }
0x1839   :  { %v1387_v61 = vpop.permute.xlu1 %1386 }
0x183a   :  { %v1389_v62 = vmul.f32 %v1387_v61, %v1383_v60 }
0x183c   :  { %1391 = vrot.lane.b32.xlu0 %v1389_v62, %s2013_s29 }
0x18ae   :  { %v1392_v30 = vpop.permute.xlu0 %1391 }
0x18af   :  { %v1394_v63 = vadd.f32 %v1392_v30, %v1384_v59 }
0x18b1   :  { %1958 = vtanh.f32 %v1394_v63 }
0x18bb   :  { %v1959_v7 = vpop.eup %1958 }
0x18bc   :  { %1397 = vrot.lane.b32.xlu1 %v1959_v7, %s2012_s2 }
0x18c0   :  { %1402 = vrot.lane.b32.xlu1 %v1282_v52, %s2016_s1 }
0x192e   :  { %v1398_v3 = vpop.permute.xlu1 %1397 }
0x192f   :  { %v1400_v11 = vmul.f32 %v1398_v3, %v1383_v60 }
0x1931   :  { %1407 = vrot.lane.b32.xlu0 %v1400_v11, %s2013_s29 }
0x1932   :  { %v1403_v12 = vpop.permute.xlu1 %1402 }
0x1933   :  { %1405 = vst.msk [vmem:[#allocation3] sm:$0xff] %vm51_vm2, %v1403_v12 }
0x1935   :  { %1412 = vrot.lane.b32.xlu0 %v1394_v63, %s2016_s1 }
0x19a3   :  { %v1408_v13 = vpop.permute.xlu0 %1407 }
0x19a4   :  { %1410 = vst.msk [vmem:[#allocation3 + $0x8] sm:$0xff] %vm51_vm2, %v1408_v13  ;;  %1701 = vmatmul.mubr.msk.f32.vlgmr.msra.gmra.mrb[8].mxu1 %vm51_vm2, %v1408_v13 }
0x19a7   :  { %v1413_v14 = vpop.permute.xlu0 %1412 }
0x19a8   :  { %1415 = vst.msk [vmem:[#allocation3 + $0x10] sm:$0xff] %vm51_vm2, %v1413_v14 }
0x1a77   :  { %v1499_v17 = vpop.f32.mrb[8].mxu1 }
0x1a78   :  { %v1500_v18 = vadd.f32 %v1655_v57, %v1499_v17  ;;  %v1702_v19 = vpop.f32.mrb[9].mxu1 }
0x1a7a   :  { %v1503_v20 = vmax.f32 %v1500_v18, 0.0 }
0x1a7c   :  { %1712 = vmatmul.mubr.msk.f32.vlgmr.msra.gmra.mrb[16].mxu0 %vm51_vm2, %v1503_v20 }
0x1b4f   :  { %v1584_v22 = vpop.f32.mrb[16].mxu0 }
0x1b50   :  { %v1585_v23 = vadd.f32 %v1657_v21, %v1584_v22  ;;  %v1713_v34 = vpop.f32.mrb[17].mxu0 }
0x1b52   :  { %1588 = vst [vmem:[#allocation8] sm:$0xff] %v1585_v23 }
0x1b53   :  { %1993 = shalt.err (!%p1990_p12)
}
0x1b54   :  { %s1994_s19 = scalar_lea.hbm %s2490_s9, 128 }
0x1b55   :  { %p1995_p13 = scmp.ne.s32.totalorder %s2490_s9, %s1994_s19  ;;  %p1998_p0 = scmp.lt.u32.totalorder %s1994_s19, %s2490_s9 }
0x1b57   :  { %p2000_p1 = pnand %p1998_p0, %p1995_p13 }
0x1b59   :  { %2003 = shalt.err (!%p2000_p1)
}
0x1b5a   :  { %1598 = dma.vmem_to_hbm [thread:$0]  %s1596_s17, 128, %s2490_s9, [#allocation7]  }
0x1b5b   :  { %2006 = dma.done.wait [#allocation7], 128  }
0x1b5c   :  { %2007 = vsyncadd [#allocation7], 4294967168 }
0x1b5d   :  { %1602 = vsyncpa [#allocation6], 1 }
0x1b5e   :  { %1603 = vsyncpa [#allocation7], 1 }

</bundles_post_ra>
